<compile_context>
chip_gen: v6e
topology: v6e:2x2x1
jax: 0.10.0
libtpu: 0.0.40
codegen_flags: <defaults>
</compile_context>

<pallas_src>
import jax
import jax.numpy as jnp
from jax.experimental import pallas as pl
from jax.experimental.pallas import tpu as pltpu


# ----------------------------------------------------------------------------
# Chip-dependent VMEM budgeting (v5e/v6e: 128 MiB physical, v7x: 64 MiB).
# ----------------------------------------------------------------------------
def _tpu_vmem_capacity_bytes():
    try:
        return int(pltpu.get_tpu_info().vmem_capacity_bytes)
    except Exception:
        return 64 << 20          # conservative fallback (v7x per-TC physical)


_VMEM_CAP = _tpu_vmem_capacity_bytes()
_VMEM_DATA_BUDGET = min(_VMEM_CAP // 4, 36 << 20)     # 32-36 MiB on v5e/v6e, 16 MiB on v7x
_VMEM_LIMIT = min((_VMEM_CAP * 3) // 4, 96 << 20)     # explicit scoped-VMEM limit


# ----------------------------------------------------------------------------
# Fused kernel: DSAE (1x1 conv + spatial soft-argmax) + MLP + basis assembly
# ----------------------------------------------------------------------------
def _fused_kernel(x_ref, wc_ref, bc_ref, red_ref,
                  w1x_ref, w1y_ref, b1_ref, w2_ref, b2_ref, w3_ref, b3_ref,
                  out_ref, e_ref):
    # x_ref:   (tb, 3*HW or C*HW) raw input block (channel c at lanes [c*HW, (c+1)*HW))
    # wc_ref:  (K, 3)  SMEM 1x1-conv weight;  bc_ref: (K,) SMEM bias
    # red_ref: (K*HW, 3K) block-diagonal reduction matrix [1 | x | y] per map
    # w1x/w1y: (K, 64) first Linear split into even/odd rows (Flatten interleave)
    # b1/b2:   (1, 64); w2: (64, 64)
    # w3_ref:  (64, 6) = fc3.weight @ basis ; b3_ref: (1, 6) = fc3.bias @ basis
    # out_ref: (tb, 6) affine parameters
    # e_ref:   (tb, K*HW) VMEM scratch for the exp maps
    K = w1x_ref.shape[0]
    HW = red_ref.shape[0] // K

    # Lane-dense f32 channel slabs (cast happens in VMEM, HBM read at raw width).
    x0 = x_ref[:, 0 * HW:1 * HW].astype(jnp.float32)          # (tb, HW)
    x1 = x_ref[:, 1 * HW:2 * HW].astype(jnp.float32)
    x2 = x_ref[:, 2 * HW:3 * HW].astype(jnp.float32)

    # dsae 1x1 conv (3 -> K) as scalar-x-vector FMAs (weights splat from SMEM),
    # numerically-stable exp written slab-by-slab into the VMEM scratch.
    for k in range(K):
        f_k = (x0 * wc_ref[k, 0] + x1 * wc_ref[k, 1] + x2 * wc_ref[k, 2]
               + bc_ref[k])                                   # (tb, HW)   VPU
        m_k = jnp.max(f_k, axis=-1, keepdims=True)            # (tb, 1)    XLU
        e_ref[:, k * HW:(k + 1) * HW] = jnp.exp(f_k - m_k)    # (tb, HW)   EUP

    # All 3K soft-argmax reductions in ONE MXU matmul:
    #   r[:, 0:K]   = sum_p e_k        r[:, K:2K] = sum_p e_k * x
    #   r[:, 2K:3K] = sum_p e_k * y
    r = jnp.dot(e_ref[...], red_ref[...],
                preferred_element_type=jnp.float32)           # (tb, 3K)   MXU
    inv = 1.0 / r[:, 0:K]                                     # exact divide (tiny)
    kx = r[:, K:2 * K] * inv                                  # (tb, K)
    ky = r[:, 2 * K:3 * K] * inv                              # (tb, K)

    # fc_model MLP; Flatten interleave folded into w1x/w1y, basis into w3/b3.
    h = (jnp.dot(kx, w1x_ref[...], preferred_element_type=jnp.float32)
         + jnp.dot(ky, w1y_ref[...], preferred_element_type=jnp.float32)
         + b1_ref[...])
    h = jnp.maximum(h, 0.0)
    h = jnp.dot(h, w2_ref[...], preferred_element_type=jnp.float32) + b2_ref[...]
    h = jnp.maximum(h, 0.0)
    out_ref[...] = (jnp.dot(h, w3_ref[...], preferred_element_type=jnp.float32)
                    + b3_ref[...])                            # (tb, 6)


# ----------------------------------------------------------------------------
# Grid planning: tb always a multiple of 8, grid always an even count >= 2.
# ----------------------------------------------------------------------------
def _plan_grid(B, HW, K, in_itemsize, w_blk):
    per_row = (2 * w_blk * in_itemsize        # double-buffered input block
               + 3 * HW * 4                   # f32 channel slabs
               + (K + 1) * HW * 4             # exp scratch + one transient slab
               + 32 * K * 4)                  # reductions / keypoints / hidden
    fixed = 3 * K * K * HW * 4 + (2 * K + 130) * 64 * 4   # reduction matrix + weights
    budget = max(_VMEM_DATA_BUDGET - fixed, 8 * per_row)
    tb_cap = max(8, (budget // per_row) // 8 * 8)
    # >= 2 steps, even count: both v7x TensorCores get balanced work; extra
    # (smaller) steps only cost ~0.35us each on single-TC chips.
    steps = max(2, pl.cdiv(B, tb_cap))
    steps += steps % 2
    tb = ((pl.cdiv(B, steps) + 7) // 8) * 8
    return tb, steps


# ----------------------------------------------------------------------------
# Wrapper
# ----------------------------------------------------------------------------
@jax.jit
def spatial_localisation_regressor(x, params):
    B, C, H, W = x.shape
    HW = H * W
    K = params["wc"].shape[0]

    # Free metadata reshape to (B, C*HW).  If the 3-channel slab is lane
    # aligned we DMA only channels 0..2; otherwise the block is the full
    # trailing dim (always legal).
    w_blk = 3 * HW if (3 * HW) % 128 == 0 else C * HW
    xr = x.reshape(B, C * HW)

    tb, steps = _plan_grid(B, HW, K, xr.dtype.itemsize, w_blk)
    b_pad = steps * tb
    if b_pad != B:
        xr = jnp.pad(xr, ((0, b_pad - B), (0, 0)))

    # Fold the torch nn.Flatten interleave into the first Linear and the
    # constant affine basis into the last Linear (tiny XLA-side math).
    w1x = params["w1"][0::2, :]                        # (K, 64)
    w1y = params["w1"][1::2, :]                        # (K, 64)
    w3b = params["w3"] @ params["basis"]               # (64, 6)
    b3b = params["b3"] @ params["basis"]               # (1, 6)

    # Block-diagonal soft-argmax reduction matrix (K*HW, 3K): column j*K + k is
    # [1 | x | y][:, j] restricted to map k's lane slab.
    cmat = jnp.stack([jnp.ones((HW,), jnp.float32),
                      params["coords"][0], params["coords"][1]], axis=1)   # (HW, 3)
    eye = jnp.eye(K, dtype=jnp.float32)
    red = (eye[:, None, None, :] * cmat[None, :, :, None]).reshape(K * HW, 3 * K)

    out = pl.pallas_call(
        _fused_kernel,
        out_shape=jax.ShapeDtypeStruct((b_pad, 6), jnp.float32),
        grid_spec=pltpu.PrefetchScalarGridSpec(
            num_scalar_prefetch=0,
            grid=(steps,),
            in_specs=[
                pl.BlockSpec((tb, w_blk), lambda b: (b, 0)),                 # x
                pl.BlockSpec(memory_space=pltpu.MemorySpace.SMEM),           # wc
                pl.BlockSpec(memory_space=pltpu.MemorySpace.SMEM),           # bc
                pl.BlockSpec((K * HW, 3 * K), lambda b: (0, 0)),             # red
                pl.BlockSpec((K, 64), lambda b: (0, 0)),                     # w1x
                pl.BlockSpec((K, 64), lambda b: (0, 0)),                     # w1y
                pl.BlockSpec((1, 64), lambda b: (0, 0)),                     # b1
                pl.BlockSpec((64, 64), lambda b: (0, 0)),                    # w2
                pl.BlockSpec((1, 64), lambda b: (0, 0)),                     # b2
                pl.BlockSpec((64, 6), lambda b: (0, 0)),                     # w3 @ basis
                pl.BlockSpec((1, 6), lambda b: (0, 0)),                      # b3 @ basis
            ],
            out_specs=pl.BlockSpec((tb, 6), lambda b: (b, 0)),
            scratch_shapes=[pltpu.VMEM((tb, K * HW), jnp.float32)],
        ),
        compiler_params=pltpu.CompilerParams(
            dimension_semantics=("parallel",),
            vmem_limit_bytes=_VMEM_LIMIT),
    )(xr, params["wc"], params["bc"], red,
      w1x, w1y, params["b1"], params["w2"], params["b2"], w3b, b3b)

    return out[:B]


# ----------------------------------------------------------------------------
# Deterministic parameter init (mirrors the module __init__; torch Linear
# weights are (out,in) — we store the transpose (in,out), same math).
# ----------------------------------------------------------------------------
def init_params(key, *, K, H, W):
    latent_dimension = 2 * K
    k_wc, k_w1, k_w2 = jax.random.split(key, 3)

    # synthetic dsae: 1x1 conv 3 -> K
    wc = 0.1 * jax.random.normal(k_wc, (K, 3), jnp.float32)
    bc = jnp.zeros((K,), jnp.float32)

    # pixel coordinate grid in [-1, 1]; flat index = h*W + w; row0=x, row1=y
    xs = jnp.linspace(-1.0, 1.0, W, dtype=jnp.float32)
    ys = jnp.linspace(-1.0, 1.0, H, dtype=jnp.float32)
    gx, gy = jnp.meshgrid(xs, ys, indexing="xy")                 # both (H, W)
    coords = jnp.stack([gx.reshape(-1), gy.reshape(-1)], axis=0)  # (2, HW)

    # fc_model: Linear(latent,64) -> ReLU -> Linear(64,64) -> ReLU -> Linear(64,3)
    w1 = 0.1 * jax.random.normal(k_w1, (latent_dimension, 64), jnp.float32)
    b1 = jnp.zeros((1, 64), jnp.float32)
    w2 = 0.1 * jax.random.normal(k_w2, (64, 64), jnp.float32)
    b2 = jnp.zeros((1, 64), jnp.float32)
    w3 = jnp.zeros((64, 3), jnp.float32)                # weight.data.zero_()
    b3 = jnp.array([[1.0, 0.0, 0.0]], jnp.float32)      # bias <- [1, 0, 0]

    basis = jnp.array(
        [[1.0, 0.0, 0.0, 0.0, 1.0, 0.0],   # scale_position
         [0.0, 0.0, 1.0, 0.0, 0.0, 0.0],   # t_x_position
         [0.0, 0.0, 0.0, 0.0, 0.0, 1.0]],  # t_y_position
        jnp.float32)

    return dict(wc=wc, bc=bc, coords=coords, w1=w1, b1=b1, w2=w2, b2=b2,
                w3=w3, b3=b3, basis=basis)


# pure-JAX reference for correctness checking
def reference(x, params):
    with jax.default_matmul_precision("highest"):
        B, C, H, W = x.shape
        x3 = x[:, :3].reshape(B, 3, H * W).astype(jnp.float32)
        f = jnp.einsum("kc,bcp->bkp", params["wc"], x3) + params["bc"][None, :, None]
        sm = jax.nn.softmax(f, axis=-1)
        kp = jnp.einsum("bkp,dp->bkd", sm, params["coords"])     # (B, K, 2)
        feats = kp.reshape(B, -1)               # interleaved, like nn.Flatten
        h = jax.nn.relu(feats @ params["w1"] + params["b1"])
        h = jax.nn.relu(h @ params["w2"] + params["b2"])
        res = h @ params["w3"] + params["b3"]                    # (B, 3)
        return res @ params["basis"]                             # (B, 6)


if __name__ == "__main__":
    B, C, H, W = 2, 4, 16, 16
    K = 8                              # latent_dimension = 16
    key = jax.random.PRNGKey(0)
    k_x, k_p, k_w3 = jax.random.split(key, 3)
    x = jax.random.normal(k_x, (B, C, H, W), jnp.float32)
    params = init_params(k_p, K=K, H=H, W=W)

    out = jax.block_until_ready(spatial_localisation_regressor(x, params))
    ref = reference(x, params)

    assert out.shape == (B, 6), out.shape
    assert jnp.allclose(out, ref, atol=1e-5, rtol=1e-5), (out, ref)
    # zero-init last layer + bias [1,0,0]  =>  identity affine params
    assert jnp.allclose(out, jnp.array([[1., 0., 0., 0., 1., 0.]]), atol=1e-5)

    # exercise the full keypoint -> MLP path with a non-trivial last layer
    # (default MXU matmul precision => slightly looser tolerance)
    params2 = dict(params, w3=0.1 * jax.random.normal(k_w3, (64, 3), jnp.float32))
    out2 = jax.block_until_ready(spatial_localisation_regressor(x, params2))
    ref2 = reference(x, params2)
    assert jnp.allclose(out2, ref2, atol=1e-2, rtol=1e-2), (out2, ref2)

    print("KERNEL_OK")
</pallas_src>

<mosaic_0001>
module attributes {stable_mosaic.version = 11 : i64} {
  func.func @_fused_kernel(%arg0: i32, %arg1: memref<8x768xf32, #tpu.memory_space<vmem>>, %arg2: memref<8x3xf32, #tpu.memory_space<smem>>, %arg3: memref<8xf32, #tpu.memory_space<smem>>, %arg4: memref<2048x24xf32, #tpu.memory_space<vmem>>, %arg5: memref<8x64xf32, #tpu.memory_space<vmem>>, %arg6: memref<8x64xf32, #tpu.memory_space<vmem>>, %arg7: memref<1x64xf32, #tpu.memory_space<vmem>>, %arg8: memref<64x64xf32, #tpu.memory_space<vmem>>, %arg9: memref<1x64xf32, #tpu.memory_space<vmem>>, %arg10: memref<64x6xf32, #tpu.memory_space<vmem>>, %arg11: memref<1x6xf32, #tpu.memory_space<vmem>>, %arg12: memref<8x6xf32, #tpu.memory_space<vmem>>, %arg13: memref<8x2048xf32, #tpu.memory_space<vmem>>) attributes {dimension_semantics = [#tpu.dimension_semantics<parallel>], iteration_bounds = array<i64: 2>, scalar_prefetch = 0 : i64, scratch_operands = 1 : i64, tpu.core_type = #tpu.core_type<tc>, window_params = [{transform_indices = @transform_0, window_bounds = array<i64: 8, 768>}, {transform_indices = @transform_1, window_bounds = array<i64: 8, 3>}, {transform_indices = @transform_2, window_bounds = array<i64: 8>}, {pipeline_mode = #tpu.pipeline_mode<synchronous>, transform_indices = @transform_3, window_bounds = array<i64: 2048, 24>}, {pipeline_mode = #tpu.pipeline_mode<synchronous>, transform_indices = @transform_4, window_bounds = array<i64: 8, 64>}, {pipeline_mode = #tpu.pipeline_mode<synchronous>, transform_indices = @transform_5, window_bounds = array<i64: 8, 64>}, {pipeline_mode = #tpu.pipeline_mode<synchronous>, transform_indices = @transform_6, window_bounds = array<i64: 1, 64>}, {pipeline_mode = #tpu.pipeline_mode<synchronous>, transform_indices = @transform_7, window_bounds = array<i64: 64, 64>}, {pipeline_mode = #tpu.pipeline_mode<synchronous>, transform_indices = @transform_8, window_bounds = array<i64: 1, 64>}, {pipeline_mode = #tpu.pipeline_mode<synchronous>, transform_indices = @transform_9, window_bounds = array<i64: 64, 6>}, {pipeline_mode = #tpu.pipeline_mode<synchronous>, transform_indices = @transform_10, window_bounds = array<i64: 1, 6>}, {transform_indices = @transform_11, window_bounds = array<i64: 8, 6>}]} {
    %c0 = arith.constant 0 : index
    %c0_0 = arith.constant 0 : index
    %0 = vector.load %arg1[%c0, %c0_0] : memref<8x768xf32, #tpu.memory_space<vmem>>, vector<8x256xf32>
    %c0_1 = arith.constant 0 : index
    %c256 = arith.constant 256 : index
    %1 = vector.load %arg1[%c0_1, %c256] : memref<8x768xf32, #tpu.memory_space<vmem>>, vector<8x256xf32>
    %c0_2 = arith.constant 0 : index
    %c512 = arith.constant 512 : index
    %2 = vector.load %arg1[%c0_2, %c512] : memref<8x768xf32, #tpu.memory_space<vmem>>, vector<8x256xf32>
    %c0_3 = arith.constant 0 : index
    %c0_4 = arith.constant 0 : index
    %3 = memref.load %arg2[%c0_3, %c0_4] : memref<8x3xf32, #tpu.memory_space<smem>>
    %4 = vector.broadcast %3 : f32 to vector<8x256xf32>
    %5 = arith.mulf %0, %4 : vector<8x256xf32>
    %c0_5 = arith.constant 0 : index
    %c1 = arith.constant 1 : index
    %6 = memref.load %arg2[%c0_5, %c1] : memref<8x3xf32, #tpu.memory_space<smem>>
    %7 = vector.broadcast %6 : f32 to vector<8x256xf32>
    %8 = arith.mulf %1, %7 : vector<8x256xf32>
    %9 = arith.addf %5, %8 : vector<8x256xf32>
    %c0_6 = arith.constant 0 : index
    %c2 = arith.constant 2 : index
    %10 = memref.load %arg2[%c0_6, %c2] : memref<8x3xf32, #tpu.memory_space<smem>>
    %11 = vector.broadcast %10 : f32 to vector<8x256xf32>
    %12 = arith.mulf %2, %11 : vector<8x256xf32>
    %13 = arith.addf %9, %12 : vector<8x256xf32>
    %c0_7 = arith.constant 0 : index
    %14 = memref.load %arg3[%c0_7] : memref<8xf32, #tpu.memory_space<smem>>
    %15 = vector.broadcast %14 : f32 to vector<8x256xf32>
    %16 = arith.addf %13, %15 : vector<8x256xf32>
    %cst = arith.constant dense<0xFF800000> : vector<8xf32>
    %17 = vector.multi_reduction <maximumf>, %16, %cst [1] : vector<8x256xf32> to vector<8xf32>
    %18 = vector.shape_cast %17 : vector<8xf32> to vector<8x1xf32>
    %19 = vector.broadcast %18 : vector<8x1xf32> to vector<8x256xf32>
    %20 = arith.subf %16, %19 : vector<8x256xf32>
    %21 = math.exp %20 : vector<8x256xf32>
    %c0_8 = arith.constant 0 : index
    %c0_9 = arith.constant 0 : index
    %22 = vector.load %arg13[%c0_8, %c0_9] : memref<8x2048xf32, #tpu.memory_space<vmem>>, vector<8x256xf32>
    tpu.vector_store %arg13[%c0_8, %c0_9], %21 {strides = array<i32>} : memref<8x2048xf32, #tpu.memory_space<vmem>>, vector<8x256xf32>,
    %c1_10 = arith.constant 1 : index
    %c0_11 = arith.constant 0 : index
    %23 = memref.load %arg2[%c1_10, %c0_11] : memref<8x3xf32, #tpu.memory_space<smem>>
    %24 = vector.broadcast %23 : f32 to vector<8x256xf32>
    %25 = arith.mulf %0, %24 : vector<8x256xf32>
    %c1_12 = arith.constant 1 : index
    %c1_13 = arith.constant 1 : index
    %26 = memref.load %arg2[%c1_12, %c1_13] : memref<8x3xf32, #tpu.memory_space<smem>>
    %27 = vector.broadcast %26 : f32 to vector<8x256xf32>
    %28 = arith.mulf %1, %27 : vector<8x256xf32>
    %29 = arith.addf %25, %28 : vector<8x256xf32>
    %c1_14 = arith.constant 1 : index
    %c2_15 = arith.constant 2 : index
    %30 = memref.load %arg2[%c1_14, %c2_15] : memref<8x3xf32, #tpu.memory_space<smem>>
    %31 = vector.broadcast %30 : f32 to vector<8x256xf32>
    %32 = arith.mulf %2, %31 : vector<8x256xf32>
    %33 = arith.addf %29, %32 : vector<8x256xf32>
    %c1_16 = arith.constant 1 : index
    %34 = memref.load %arg3[%c1_16] : memref<8xf32, #tpu.memory_space<smem>>
    %35 = vector.broadcast %34 : f32 to vector<8x256xf32>
    %36 = arith.addf %33, %35 : vector<8x256xf32>
    %cst_17 = arith.constant dense<0xFF800000> : vector<8xf32>
    %37 = vector.multi_reduction <maximumf>, %36, %cst_17 [1] : vector<8x256xf32> to vector<8xf32>
    %38 = vector.shape_cast %37 : vector<8xf32> to vector<8x1xf32>
    %39 = vector.broadcast %38 : vector<8x1xf32> to vector<8x256xf32>
    %40 = arith.subf %36, %39 : vector<8x256xf32>
    %41 = math.exp %40 : vector<8x256xf32>
    %c0_18 = arith.constant 0 : index
    %c256_19 = arith.constant 256 : index
    %42 = vector.load %arg13[%c0_18, %c256_19] : memref<8x2048xf32, #tpu.memory_space<vmem>>, vector<8x256xf32>
    tpu.vector_store %arg13[%c0_18, %c256_19], %41 {strides = array<i32>} : memref<8x2048xf32, #tpu.memory_space<vmem>>, vector<8x256xf32>,
    %c2_20 = arith.constant 2 : index
    %c0_21 = arith.constant 0 : index
    %43 = memref.load %arg2[%c2_20, %c0_21] : memref<8x3xf32, #tpu.memory_space<smem>>
    %44 = vector.broadcast %43 : f32 to vector<8x256xf32>
    %45 = arith.mulf %0, %44 : vector<8x256xf32>
    %c2_22 = arith.constant 2 : index
    %c1_23 = arith.constant 1 : index
    %46 = memref.load %arg2[%c2_22, %c1_23] : memref<8x3xf32, #tpu.memory_space<smem>>
    %47 = vector.broadcast %46 : f32 to vector<8x256xf32>
    %48 = arith.mulf %1, %47 : vector<8x256xf32>
    %49 = arith.addf %45, %48 : vector<8x256xf32>
    %c2_24 = arith.constant 2 : index
    %c2_25 = arith.constant 2 : index
    %50 = memref.load %arg2[%c2_24, %c2_25] : memref<8x3xf32, #tpu.memory_space<smem>>
    %51 = vector.broadcast %50 : f32 to vector<8x256xf32>
    %52 = arith.mulf %2, %51 : vector<8x256xf32>
    %53 = arith.addf %49, %52 : vector<8x256xf32>
    %c2_26 = arith.constant 2 : index
    %54 = memref.load %arg3[%c2_26] : memref<8xf32, #tpu.memory_space<smem>>
    %55 = vector.broadcast %54 : f32 to vector<8x256xf32>
    %56 = arith.addf %53, %55 : vector<8x256xf32>
    %cst_27 = arith.constant dense<0xFF800000> : vector<8xf32>
    %57 = vector.multi_reduction <maximumf>, %56, %cst_27 [1] : vector<8x256xf32> to vector<8xf32>
    %58 = vector.shape_cast %57 : vector<8xf32> to vector<8x1xf32>
    %59 = vector.broadcast %58 : vector<8x1xf32> to vector<8x256xf32>
    %60 = arith.subf %56, %59 : vector<8x256xf32>
    %61 = math.exp %60 : vector<8x256xf32>
    %c0_28 = arith.constant 0 : index
    %c512_29 = arith.constant 512 : index
    %62 = vector.load %arg13[%c0_28, %c512_29] : memref<8x2048xf32, #tpu.memory_space<vmem>>, vector<8x256xf32>
    tpu.vector_store %arg13[%c0_28, %c512_29], %61 {strides = array<i32>} : memref<8x2048xf32, #tpu.memory_space<vmem>>, vector<8x256xf32>,
    %c3 = arith.constant 3 : index
    %c0_30 = arith.constant 0 : index
    %63 = memref.load %arg2[%c3, %c0_30] : memref<8x3xf32, #tpu.memory_space<smem>>
    %64 = vector.broadcast %63 : f32 to vector<8x256xf32>
    %65 = arith.mulf %0, %64 : vector<8x256xf32>
    %c3_31 = arith.constant 3 : index
    %c1_32 = arith.constant 1 : index
    %66 = memref.load %arg2[%c3_31, %c1_32] : memref<8x3xf32, #tpu.memory_space<smem>>
    %67 = vector.broadcast %66 : f32 to vector<8x256xf32>
    %68 = arith.mulf %1, %67 : vector<8x256xf32>
    %69 = arith.addf %65, %68 : vector<8x256xf32>
    %c3_33 = arith.constant 3 : index
    %c2_34 = arith.constant 2 : index
    %70 = memref.load %arg2[%c3_33, %c2_34] : memref<8x3xf32, #tpu.memory_space<smem>>
    %71 = vector.broadcast %70 : f32 to vector<8x256xf32>
    %72 = arith.mulf %2, %71 : vector<8x256xf32>
    %73 = arith.addf %69, %72 : vector<8x256xf32>
    %c3_35 = arith.constant 3 : index
    %74 = memref.load %arg3[%c3_35] : memref<8xf32, #tpu.memory_space<smem>>
    %75 = vector.broadcast %74 : f32 to vector<8x256xf32>
    %76 = arith.addf %73, %75 : vector<8x256xf32>
    %cst_36 = arith.constant dense<0xFF800000> : vector<8xf32>
    %77 = vector.multi_reduction <maximumf>, %76, %cst_36 [1] : vector<8x256xf32> to vector<8xf32>
    %78 = vector.shape_cast %77 : vector<8xf32> to vector<8x1xf32>
    %79 = vector.broadcast %78 : vector<8x1xf32> to vector<8x256xf32>
    %80 = arith.subf %76, %79 : vector<8x256xf32>
    %81 = math.exp %80 : vector<8x256xf32>
    %c0_37 = arith.constant 0 : index
    %c768 = arith.constant 768 : index
    %82 = vector.load %arg13[%c0_37, %c768] : memref<8x2048xf32, #tpu.memory_space<vmem>>, vector<8x256xf32>
    tpu.vector_store %arg13[%c0_37, %c768], %81 {strides = array<i32>} : memref<8x2048xf32, #tpu.memory_space<vmem>>, vector<8x256xf32>,
    %c4 = arith.constant 4 : index
    %c0_38 = arith.constant 0 : index
    %83 = memref.load %arg2[%c4, %c0_38] : memref<8x3xf32, #tpu.memory_space<smem>>
    %84 = vector.broadcast %83 : f32 to vector<8x256xf32>
    %85 = arith.mulf %0, %84 : vector<8x256xf32>
    %c4_39 = arith.constant 4 : index
    %c1_40 = arith.constant 1 : index
    %86 = memref.load %arg2[%c4_39, %c1_40] : memref<8x3xf32, #tpu.memory_space<smem>>
    %87 = vector.broadcast %86 : f32 to vector<8x256xf32>
    %88 = arith.mulf %1, %87 : vector<8x256xf32>
    %89 = arith.addf %85, %88 : vector<8x256xf32>
    %c4_41 = arith.constant 4 : index
    %c2_42 = arith.constant 2 : index
    %90 = memref.load %arg2[%c4_41, %c2_42] : memref<8x3xf32, #tpu.memory_space<smem>>
    %91 = vector.broadcast %90 : f32 to vector<8x256xf32>
    %92 = arith.mulf %2, %91 : vector<8x256xf32>
    %93 = arith.addf %89, %92 : vector<8x256xf32>
    %c4_43 = arith.constant 4 : index
    %94 = memref.load %arg3[%c4_43] : memref<8xf32, #tpu.memory_space<smem>>
    %95 = vector.broadcast %94 : f32 to vector<8x256xf32>
    %96 = arith.addf %93, %95 : vector<8x256xf32>
    %cst_44 = arith.constant dense<0xFF800000> : vector<8xf32>
    %97 = vector.multi_reduction <maximumf>, %96, %cst_44 [1] : vector<8x256xf32> to vector<8xf32>
    %98 = vector.shape_cast %97 : vector<8xf32> to vector<8x1xf32>
    %99 = vector.broadcast %98 : vector<8x1xf32> to vector<8x256xf32>
    %100 = arith.subf %96, %99 : vector<8x256xf32>
    %101 = math.exp %100 : vector<8x256xf32>
    %c0_45 = arith.constant 0 : index
    %c1024 = arith.constant 1024 : index
    %102 = vector.load %arg13[%c0_45, %c1024] : memref<8x2048xf32, #tpu.memory_space<vmem>>, vector<8x256xf32>
    tpu.vector_store %arg13[%c0_45, %c1024], %101 {strides = array<i32>} : memref<8x2048xf32, #tpu.memory_space<vmem>>, vector<8x256xf32>,
    %c5 = arith.constant 5 : index
    %c0_46 = arith.constant 0 : index
    %103 = memref.load %arg2[%c5, %c0_46] : memref<8x3xf32, #tpu.memory_space<smem>>
    %104 = vector.broadcast %103 : f32 to vector<8x256xf32>
    %105 = arith.mulf %0, %104 : vector<8x256xf32>
    %c5_47 = arith.constant 5 : index
    %c1_48 = arith.constant 1 : index
    %106 = memref.load %arg2[%c5_47, %c1_48] : memref<8x3xf32, #tpu.memory_space<smem>>
    %107 = vector.broadcast %106 : f32 to vector<8x256xf32>
    %108 = arith.mulf %1, %107 : vector<8x256xf32>
    %109 = arith.addf %105, %108 : vector<8x256xf32>
    %c5_49 = arith.constant 5 : index
    %c2_50 = arith.constant 2 : index
    %110 = memref.load %arg2[%c5_49, %c2_50] : memref<8x3xf32, #tpu.memory_space<smem>>
    %111 = vector.broadcast %110 : f32 to vector<8x256xf32>
    %112 = arith.mulf %2, %111 : vector<8x256xf32>
    %113 = arith.addf %109, %112 : vector<8x256xf32>
    %c5_51 = arith.constant 5 : index
    %114 = memref.load %arg3[%c5_51] : memref<8xf32, #tpu.memory_space<smem>>
    %115 = vector.broadcast %114 : f32 to vector<8x256xf32>
    %116 = arith.addf %113, %115 : vector<8x256xf32>
    %cst_52 = arith.constant dense<0xFF800000> : vector<8xf32>
    %117 = vector.multi_reduction <maximumf>, %116, %cst_52 [1] : vector<8x256xf32> to vector<8xf32>
    %118 = vector.shape_cast %117 : vector<8xf32> to vector<8x1xf32>
    %119 = vector.broadcast %118 : vector<8x1xf32> to vector<8x256xf32>
    %120 = arith.subf %116, %119 : vector<8x256xf32>
    %121 = math.exp %120 : vector<8x256xf32>
    %c0_53 = arith.constant 0 : index
    %c1280 = arith.constant 1280 : index
    %122 = vector.load %arg13[%c0_53, %c1280] : memref<8x2048xf32, #tpu.memory_space<vmem>>, vector<8x256xf32>
    tpu.vector_store %arg13[%c0_53, %c1280], %121 {strides = array<i32>} : memref<8x2048xf32, #tpu.memory_space<vmem>>, vector<8x256xf32>,
    %c6 = arith.constant 6 : index
    %c0_54 = arith.constant 0 : index
    %123 = memref.load %arg2[%c6, %c0_54] : memref<8x3xf32, #tpu.memory_space<smem>>
    %124 = vector.broadcast %123 : f32 to vector<8x256xf32>
    %125 = arith.mulf %0, %124 : vector<8x256xf32>
    %c6_55 = arith.constant 6 : index
    %c1_56 = arith.constant 1 : index
    %126 = memref.load %arg2[%c6_55, %c1_56] : memref<8x3xf32, #tpu.memory_space<smem>>
    %127 = vector.broadcast %126 : f32 to vector<8x256xf32>
    %128 = arith.mulf %1, %127 : vector<8x256xf32>
    %129 = arith.addf %125, %128 : vector<8x256xf32>
    %c6_57 = arith.constant 6 : index
    %c2_58 = arith.constant 2 : index
    %130 = memref.load %arg2[%c6_57, %c2_58] : memref<8x3xf32, #tpu.memory_space<smem>>
    %131 = vector.broadcast %130 : f32 to vector<8x256xf32>
    %132 = arith.mulf %2, %131 : vector<8x256xf32>
    %133 = arith.addf %129, %132 : vector<8x256xf32>
    %c6_59 = arith.constant 6 : index
    %134 = memref.load %arg3[%c6_59] : memref<8xf32, #tpu.memory_space<smem>>
    %135 = vector.broadcast %134 : f32 to vector<8x256xf32>
    %136 = arith.addf %133, %135 : vector<8x256xf32>
    %cst_60 = arith.constant dense<0xFF800000> : vector<8xf32>
    %137 = vector.multi_reduction <maximumf>, %136, %cst_60 [1] : vector<8x256xf32> to vector<8xf32>
    %138 = vector.shape_cast %137 : vector<8xf32> to vector<8x1xf32>
    %139 = vector.broadcast %138 : vector<8x1xf32> to vector<8x256xf32>
    %140 = arith.subf %136, %139 : vector<8x256xf32>
    %141 = math.exp %140 : vector<8x256xf32>
    %c0_61 = arith.constant 0 : index
    %c1536 = arith.constant 1536 : index
    %142 = vector.load %arg13[%c0_61, %c1536] : memref<8x2048xf32, #tpu.memory_space<vmem>>, vector<8x256xf32>
    tpu.vector_store %arg13[%c0_61, %c1536], %141 {strides = array<i32>} : memref<8x2048xf32, #tpu.memory_space<vmem>>, vector<8x256xf32>,
    %c7 = arith.constant 7 : index
    %c0_62 = arith.constant 0 : index
    %143 = memref.load %arg2[%c7, %c0_62] : memref<8x3xf32, #tpu.memory_space<smem>>
    %144 = vector.broadcast %143 : f32 to vector<8x256xf32>
    %145 = arith.mulf %0, %144 : vector<8x256xf32>
    %c7_63 = arith.constant 7 : index
    %c1_64 = arith.constant 1 : index
    %146 = memref.load %arg2[%c7_63, %c1_64] : memref<8x3xf32, #tpu.memory_space<smem>>
    %147 = vector.broadcast %146 : f32 to vector<8x256xf32>
    %148 = arith.mulf %1, %147 : vector<8x256xf32>
    %149 = arith.addf %145, %148 : vector<8x256xf32>
    %c7_65 = arith.constant 7 : index
    %c2_66 = arith.constant 2 : index
    %150 = memref.load %arg2[%c7_65, %c2_66] : memref<8x3xf32, #tpu.memory_space<smem>>
    %151 = vector.broadcast %150 : f32 to vector<8x256xf32>
    %152 = arith.mulf %2, %151 : vector<8x256xf32>
    %153 = arith.addf %149, %152 : vector<8x256xf32>
    %c7_67 = arith.constant 7 : index
    %154 = memref.load %arg3[%c7_67] : memref<8xf32, #tpu.memory_space<smem>>
    %155 = vector.broadcast %154 : f32 to vector<8x256xf32>
    %156 = arith.addf %153, %155 : vector<8x256xf32>
    %cst_68 = arith.constant dense<0xFF800000> : vector<8xf32>
    %157 = vector.multi_reduction <maximumf>, %156, %cst_68 [1] : vector<8x256xf32> to vector<8xf32>
    %158 = vector.shape_cast %157 : vector<8xf32> to vector<8x1xf32>
    %159 = vector.broadcast %158 : vector<8x1xf32> to vector<8x256xf32>
    %160 = arith.subf %156, %159 : vector<8x256xf32>
    %161 = math.exp %160 : vector<8x256xf32>
    %c0_69 = arith.constant 0 : index
    %c1792 = arith.constant 1792 : index
    %162 = vector.load %arg13[%c0_69, %c1792] : memref<8x2048xf32, #tpu.memory_space<vmem>>, vector<8x256xf32>
    tpu.vector_store %arg13[%c0_69, %c1792], %161 {strides = array<i32>} : memref<8x2048xf32, #tpu.memory_space<vmem>>, vector<8x256xf32>,
    %c0_70 = arith.constant 0 : index
    %c0_71 = arith.constant 0 : index
    %163 = vector.load %arg13[%c0_70, %c0_71] : memref<8x2048xf32, #tpu.memory_space<vmem>>, vector<8x2048xf32>
    %c0_72 = arith.constant 0 : index
    %c0_73 = arith.constant 0 : index
    %164 = vector.load %arg4[%c0_72, %c0_73] : memref<2048x24xf32, #tpu.memory_space<vmem>>, vector<2048x24xf32>
    %cst_74 = arith.constant dense<0.000000e+00> : vector<8x24xf32>
    %165 = tpu.matmul %163, %164, %cst_74 {dimension_numbers = #tpu.dot_dimension_numbers<[1], [0], [0], [1], [0, 0, 1, 1], [], []>} : vector<8x2048xf32>, vector<2048x24xf32>, vector<8x24xf32> -> vector<8x24xf32>
    %166 = vector.extract_strided_slice %165 {offsets = [0, 0], sizes = [8, 8], strides = [1, 1]} : vector<8x24xf32> to vector<8x8xf32>
    %cst_75 = arith.constant 1.000000e+00 : f32
    %167 = vector.broadcast %cst_75 : f32 to vector<8x8xf32>
    %168 = arith.divf %167, %166 : vector<8x8xf32>
    %169 = vector.extract_strided_slice %165 {offsets = [0, 8], sizes = [8, 8], strides = [1, 1]} : vector<8x24xf32> to vector<8x8xf32>
    %170 = arith.mulf %169, %168 : vector<8x8xf32>
    %171 = vector.extract_strided_slice %165 {offsets = [0, 16], sizes = [8, 8], strides = [1, 1]} : vector<8x24xf32> to vector<8x8xf32>
    %172 = arith.mulf %171, %168 : vector<8x8xf32>
    %c0_76 = arith.constant 0 : index
    %c0_77 = arith.constant 0 : index
    %173 = vector.load %arg5[%c0_76, %c0_77] : memref<8x64xf32, #tpu.memory_space<vmem>>, vector<8x64xf32>
    %cst_78 = arith.constant dense<0.000000e+00> : vector<8x64xf32>
    %174 = tpu.matmul %170, %173, %cst_78 {dimension_numbers = #tpu.dot_dimension_numbers<[1], [0], [0], [1], [0, 0, 1, 1], [], []>} : vector<8x8xf32>, vector<8x64xf32>, vector<8x64xf32> -> vector<8x64xf32>
    %c0_79 = arith.constant 0 : index
    %c0_80 = arith.constant 0 : index
    %175 = vector.load %arg6[%c0_79, %c0_80] : memref<8x64xf32, #tpu.memory_space<vmem>>, vector<8x64xf32>
    %cst_81 = arith.constant dense<0.000000e+00> : vector<8x64xf32>
    %176 = tpu.matmul %172, %175, %cst_81 {dimension_numbers = #tpu.dot_dimension_numbers<[1], [0], [0], [1], [0, 0, 1, 1], [], []>} : vector<8x8xf32>, vector<8x64xf32>, vector<8x64xf32> -> vector<8x64xf32>
    %177 = arith.addf %174, %176 : vector<8x64xf32>
    %c0_82 = arith.constant 0 : index
    %c0_83 = arith.constant 0 : index
    %178 = vector.load %arg7[%c0_82, %c0_83] : memref<1x64xf32, #tpu.memory_space<vmem>>, vector<1x64xf32>
    %179 = vector.broadcast %178 : vector<1x64xf32> to vector<8x64xf32>
    %180 = arith.addf %177, %179 : vector<8x64xf32>
    %cst_84 = arith.constant 0.000000e+00 : f32
    %181 = vector.broadcast %cst_84 : f32 to vector<8x64xf32>
    %182 = arith.maximumf %180, %181 : vector<8x64xf32>
    %c0_85 = arith.constant 0 : index
    %c0_86 = arith.constant 0 : index
    %183 = vector.load %arg8[%c0_85, %c0_86] : memref<64x64xf32, #tpu.memory_space<vmem>>, vector<64x64xf32>
    %cst_87 = arith.constant dense<0.000000e+00> : vector<8x64xf32>
    %184 = tpu.matmul %182, %183, %cst_87 {dimension_numbers = #tpu.dot_dimension_numbers<[1], [0], [0], [1], [0, 0, 1, 1], [], []>} : vector<8x64xf32>, vector<64x64xf32>, vector<8x64xf32> -> vector<8x64xf32>
    %c0_88 = arith.constant 0 : index
    %c0_89 = arith.constant 0 : index
    %185 = vector.load %arg9[%c0_88, %c0_89] : memref<1x64xf32, #tpu.memory_space<vmem>>, vector<1x64xf32>
    %186 = vector.broadcast %185 : vector<1x64xf32> to vector<8x64xf32>
    %187 = arith.addf %184, %186 : vector<8x64xf32>
    %cst_90 = arith.constant 0.000000e+00 : f32
    %188 = vector.broadcast %cst_90 : f32 to vector<8x64xf32>
    %189 = arith.maximumf %187, %188 : vector<8x64xf32>
    %c0_91 = arith.constant 0 : index
    %c0_92 = arith.constant 0 : index
    %190 = vector.load %arg10[%c0_91, %c0_92] : memref<64x6xf32, #tpu.memory_space<vmem>>, vector<64x6xf32>
    %cst_93 = arith.constant dense<0.000000e+00> : vector<8x6xf32>
    %191 = tpu.matmul %189, %190, %cst_93 {dimension_numbers = #tpu.dot_dimension_numbers<[1], [0], [0], [1], [0, 0, 1, 1], [], []>} : vector<8x64xf32>, vector<64x6xf32>, vector<8x6xf32> -> vector<8x6xf32>
    %c0_94 = arith.constant 0 : index
    %c0_95 = arith.constant 0 : index
    %192 = vector.load %arg11[%c0_94, %c0_95] : memref<1x6xf32, #tpu.memory_space<vmem>>, vector<1x6xf32>
    %193 = vector.broadcast %192 : vector<1x6xf32> to vector<8x6xf32>
    %194 = arith.addf %191, %193 : vector<8x6xf32>
    %c0_96 = arith.constant 0 : index
    %c0_97 = arith.constant 0 : index
    %195 = vector.load %arg12[%c0_96, %c0_97] : memref<8x6xf32, #tpu.memory_space<vmem>>, vector<8x6xf32>
    tpu.vector_store %arg12[%c0_96, %c0_97], %194 {strides = array<i32>} : memref<8x6xf32, #tpu.memory_space<vmem>>, vector<8x6xf32>,
    return
  }
  func.func @transform_0(%arg0: i32) -> (i32, i32) {
    %c0_i32 = arith.constant 0 : i32
    %c0_i32_0 = arith.constant 0 : i32
    return %arg0, %c0_i32 : i32, i32
  }
  func.func @transform_1(%arg0: i32) -> (i32, i32) {
    %c0_i32 = arith.constant 0 : i32
    %c0_i32_0 = arith.constant 0 : i32
    %c0_i32_1 = arith.constant 0 : i32
    return %c0_i32, %c0_i32_0 : i32, i32
  }
  func.func @transform_2(%arg0: i32) -> i32 {
    %c0_i32 = arith.constant 0 : i32
    %c0_i32_0 = arith.constant 0 : i32
    return %c0_i32 : i32
  }
  func.func @transform_3(%arg0: i32) -> (i32, i32) {
    %c0_i32 = arith.constant 0 : i32
    %c0_i32_0 = arith.constant 0 : i32
    %c0_i32_1 = arith.constant 0 : i32
    return %c0_i32, %c0_i32_0 : i32, i32
  }
  func.func @transform_4(%arg0: i32) -> (i32, i32) {
    %c0_i32 = arith.constant 0 : i32
    %c0_i32_0 = arith.constant 0 : i32
    %c0_i32_1 = arith.constant 0 : i32
    return %c0_i32, %c0_i32_0 : i32, i32
  }
  func.func @transform_5(%arg0: i32) -> (i32, i32) {
    %c0_i32 = arith.constant 0 : i32
    %c0_i32_0 = arith.constant 0 : i32
    %c0_i32_1 = arith.constant 0 : i32
    return %c0_i32, %c0_i32_0 : i32, i32
  }
  func.func @transform_6(%arg0: i32) -> (i32, i32) {
    %c0_i32 = arith.constant 0 : i32
    %c0_i32_0 = arith.constant 0 : i32
    %c0_i32_1 = arith.constant 0 : i32
    return %c0_i32, %c0_i32_0 : i32, i32
  }
  func.func @transform_7(%arg0: i32) -> (i32, i32) {
    %c0_i32 = arith.constant 0 : i32
    %c0_i32_0 = arith.constant 0 : i32
    %c0_i32_1 = arith.constant 0 : i32
    return %c0_i32, %c0_i32_0 : i32, i32
  }
  func.func @transform_8(%arg0: i32) -> (i32, i32) {
    %c0_i32 = arith.constant 0 : i32
    %c0_i32_0 = arith.constant 0 : i32
    %c0_i32_1 = arith.constant 0 : i32
    return %c0_i32, %c0_i32_0 : i32, i32
  }
  func.func @transform_9(%arg0: i32) -> (i32, i32) {
    %c0_i32 = arith.constant 0 : i32
    %c0_i32_0 = arith.constant 0 : i32
    %c0_i32_1 = arith.constant 0 : i32
    return %c0_i32, %c0_i32_0 : i32, i32
  }
  func.func @transform_10(%arg0: i32) -> (i32, i32) {
    %c0_i32 = arith.constant 0 : i32
    %c0_i32_0 = arith.constant 0 : i32
    %c0_i32_1 = arith.constant 0 : i32
    return %c0_i32, %c0_i32_0 : i32, i32
  }
  func.func @transform_11(%arg0: i32) -> (i32, i32) {
    %c0_i32 = arith.constant 0 : i32
    %c0_i32_0 = arith.constant 0 : i32
    return %arg0, %c0_i32 : i32, i32
  }
}

</mosaic_0001>

<bundles_post_ra>
// kernel: spatial_localisation_regressor.1
= control target key start
LH: loop header
LB: loop body
LE: loop exit
PB: predicated region body
PF: predicated region fallthrough
CT: control target
= control target key end

     0   :  { %16 = vsyncpa [#allocation4], 0  ;;  %s3650_s0 = inlined_call_operand.vmem [shape: f32[16,1024], index: 0, kind: input, shape index: {}]   ;;  %s3651_s1 = inlined_call_operand.vmem [shape: f32[8,3], index: 1, kind: input, shape index: {}]   ;;  %s3652_s2 = inlined_call_operand.vmem [shape: f32[8], index: 2, kind: input, shape index: {}]   ;;  %s3653_s3 = inlined_call_operand.vmem [shape: f32[2048,24], index: 3, kind: input, shape index: {}]   ;;  %s3654_s4 = inlined_call_operand.vmem [shape: f32[8,64], index: 4, kind: input, shape index: {}]   ;;  %s3655_s5 = inlined_call_operand.vmem [shape: f32[8,64], index: 5, kind: input, shape index: {}]   ;;  %s3656_s6 = inlined_call_operand.vmem [shape: f32[1,64], index: 6, kind: input, shape index: {}]   ;;  %s3657_s7 = inlined_call_operand.vmem [shape: f32[64,64], index: 7, kind: input, shape index: {}]   ;;  %s3658_s8 = inlined_call_operand.vmem [shape: f32[1,64], index: 8, kind: input, shape index: {}]   ;;  %s3659_s9 = inlined_call_operand.vmem [shape: f32[64,6], index: 9, kind: input, shape index: {}]   ;;  %s3660_s10 = inlined_call_operand.vmem [shape: f32[1,6], index: 10, kind: input, shape index: {}]   ;;  %s3661_s11 = inlined_call_operand.vmem [shape: f32[16,6], index: 11, kind: output, shape index: {}]  }
   0x1   :  { %17 = vsyncpa [#allocation6], 0  ;;  %s2511_s17 = smov 0  }
   0x2 LB: > { %s2517_s18 = sadd.s32 4294967295, %s2441_s17   ;;  %p1928_p0 = scmp.ge.s32.totalorder %s2441_s17, 1  ;;  %s2441_s17 = sphi %s2511_s17, %s23_s17  }
   0x3   : > { %p290_p1 = scmp.lt.s32.totalorder %s2441_s17, 3  ;;  %s303_s21 = sshll.u32 %s3651_s1, 4  ;;  %s304_s21 = int_to_ptr.vmem [resolvable:$true] %s303_s21 }
   0x4   : > { %p3662_p3 = scmp.eq.s32.totalorder %s2517_s18, 0  ;;  %s314_s25 = sshll.u32 %s3652_s2, 4  ;;  %s315_s25 = int_to_ptr.vmem [resolvable:$true] %s314_s25 }
   0x5   : > { %p2524_p2 = pnand %p1928_p0, %p290_p1  ;;  %s2397_s27 = scalar_lea.vmem %s304_s21, 128 }
   0x6   : > { %p2398_p6 = scmp.ne.s32.totalorder %s304_s21, %s2397_s27  ;;  %p2405_p10 = scmp.lt.s32.totalorder %s304_s21, %s304_s21 }
   0x7   : > { %s3664_s22 = scalar_select %p2524_p2, 1, 0 }
   0x8   : > { %p2336_p4 = pneg %p2524_p2  ;;  %p2406_p11 = scmp.lt.s32.totalorder %s2397_s27, %s2397_s27 }
   0xa   : > { %p2536_p5 = pnand %p3662_p3, %p2336_p4  ;;  %p2407_p12 = por %p2406_p11, %p2405_p10 }
   0xc   : > { %p2399_p7 = pneg %p2536_p5 }
   0xe   : > { %p2400_p8 = pnand %p2399_p7, %p2398_p6 }
  0x10   : > { %p2401_p9 = pneg %p2400_p8 }
  0x12   : > { %p2408_p13 = pnand %p2407_p12, %p2401_p9 }
  0x14   : > { %2411 = shalt.err (!%p2408_p13)
}
  0x15   : > { %s2443_s28 = smov [#allocation3]   ;;  %s2412_s29 = scalar_lea.vmem %s315_s25, 16 }
  0x16   : > { %2339 = dma.vmem_to_smem (!%p2536_p5), %s304_s21, 128, %s2443_s28, [#allocation4]  }
  0x17   : > { %p2413_p0 = scmp.ne.s32.totalorder %s315_s25, %s2412_s29  ;;  %p2420_p3 = scmp.lt.s32.totalorder %s315_s25, %s315_s25 }
  0x18   : > { %p2421_p2 = scmp.lt.s32.totalorder %s2412_s29, %s2412_s29 }
  0x19   : > { %p2415_p1 = pnand %p2413_p0, %p2399_p7 }
  0x1a   : > { %p2422_p6 = por %p2421_p2, %p2420_p3 }
  0x1b   : > { %p2416_p4 = pneg %p2415_p1 }
  0x1d   : > { %p2423_p8 = pnand %p2422_p6, %p2416_p4 }
  0x1f   : > { %2426 = shalt.err (!%p2423_p8)
}
  0x20   : > { %s2444_s30 = smov [#allocation5]   ;;  %p3666_p9 = scmp.ne.s32.totalorder %s3664_s22, 0 }
  0x21   : > { %2342 = dma.vmem_to_smem (!%p2536_p5), %s315_s25, 16, %s2444_s30, [#allocation6]  }
  0x22   : > { %359 = sbr.rel (%p3666_p9) target bundleno = 1368 (0x558), region = 64  ;;  %p3667_p10 = scmp.eq.s32.totalorder (!%p3666_p9), %s2517_s18, 0 }
  0x27   : > { %2432 = dma.done.wait (%p3667_p10), [#allocation4], 128   ;;  %p3668_p11 = pmov %p3667_p10 }
  0x28   : > { %p3669_p7 = pmov %p3667_p10 }
  0x29   : > { %2434 = vsyncadd (%p3668_p11), [#allocation4], 4294967168 }
  0x2a   : > { %2436 = dma.done.wait (%p3669_p7), [#allocation6], 16   ;;  %p3670_p2 = pmov %p3669_p7 }
  0x2c   : > { %2438 = vsyncadd (%p3670_p2), [#allocation6], 4294967280 }
  0x2d   : > { %369 = sfence }
  0x2e   : > { %p403_p3 = scmp.lt.s32.totalorder %s2517_s18, 1  ;;  %s2557_s12 = sld [smem:[#allocation3]]  ;;  %v713_v0 = vld [vmem:[%s3653_s3 + $0xf8] sm:$0xff]  ;;  %v712_v2 = vld [vmem:[%s3653_s3 + $0xf0] sm:$0xff]  ;;  %v711_v5 = vld [vmem:[%s3653_s3 + $0xe8] sm:$0xff]  ;;  %vm2446_vm0 = vmmov 0  }
  0x2f   : > { %v697_v1 = vld [vmem:[%s3653_s3 + $0x78] sm:$0xff]  ;;  %s2568_s21 = sld [smem:[#allocation3 + $0x1]]  ;;  %1978 = vmatprep.subr.mxu0 %v713_v0  ;;  %v696_v3 = vld [vmem:[%s3653_s3 + $0x70] sm:$0xff]  ;;  %v695_v6 = vld [vmem:[%s3653_s3 + $0x68] sm:$0xff]  ;;  %vm1514_vm1 = vcmask 64512   ;;  %vm1686_vm2 = vcmask 523264  }
  0x30   : > { %v745_v4 = vld [vmem:[%s3653_s3 + $0x1f8] sm:$0xff]  ;;  %s3672_s18 = smov (!%p403_p3, %s2517_s18), 1  ;;  %1979 = vmatpush3.msra.mxu0 %v697_v1  ;;  %s2588_s14 = sld [smem:[#allocation3 + $0x2]]  ;;  %v710_v8 = vld [vmem:[%s3653_s3 + $0xe0] sm:$0xff]  ;;  %v744_v9 = vld [vmem:[%s3653_s3 + $0x1f0] sm:$0xff]  ;;  %vm1849_vm3 = vcmask 48128  }
  0x31   : > { %2013 = vmatprep.subr.mxu1 %v745_v4  ;;  %v729_v7 = vld [vmem:[%s3653_s3 + $0x178] sm:$0xff]  ;;  %1980 = vmatprep.subr.mxu0 %v712_v2  ;;  %v728_v10 = vld [vmem:[%s3653_s3 + $0x170] sm:$0xff]  ;;  %s1977_s24 = sshll.u32 %s3672_s18, 6  ;;  %s2600_s25 = sld [smem:[#allocation5]]  ;;  %v694_v11 = vld [vmem:[%s3653_s3 + $0x60] sm:$0xff] }
  0x32   : > { %2014 = vmatpush3.msra.mxu1 %v729_v7  ;;  %1981 = vmatpush3.msra.mxu0 %v696_v3  ;;  %v709_v12 = vld [vmem:[%s3653_s3 + $0xd8] sm:$0xff]  ;;  %v743_v13 = vld [vmem:[%s3653_s3 + $0x1e8] sm:$0xff]  ;;  %s407_s19 = scalar_lea.vmem %s3650_s0, %s1977_s24  ;;  %s2614_s20 = sld [smem:[#allocation3 + $0x80]]  ;;  %v742_v16 = vld [vmem:[%s3653_s3 + $0x1e0] sm:$0xff] }
  0x33   : > { %2015 = vmatprep.subr.mxu1 %v744_v9  ;;  %1982 = vmatprep.subr.mxu0 %v711_v5  ;;  %v693_v14 = vld [vmem:[%s3653_s3 + $0x58] sm:$0xff]  ;;  %v727_v15 = vld [vmem:[%s3653_s3 + $0x168] sm:$0xff]  ;;  %v2625_v17 = vld [vmem:[%s407_s19] sm:$0xff]  ;;  %s2632_s24 = sld [smem:[#allocation3 + $0x81]] }
  0x34   : > { %2016 = vmatpush3.msra.mxu1 %v728_v10  ;;  %v2627_v18 = vld [vmem:[%s407_s19 + $0x8] sm:$0xff]  ;;  %v2629_v19 = vld [vmem:[%s407_s19 + $0x10] sm:$0xff]  ;;  %v419_v20 = vstv %s2557_s12  ;;  %1983 = vmatpush3.msra.mxu0 %v695_v6  ;;  %v2634_v21 = vld [vmem:[%s407_s19 + $0x18] sm:$0xff]  ;;  %s2643_s30 = sld [smem:[#allocation3 + $0x82]] }
  0x35   : > { %2017 = vmatprep.subr.mxu1 %v743_v13  ;;  %v2636_v22 = vld [vmem:[%s407_s19 + $0x20] sm:$0xff]  ;;  %v2638_v23 = vld [vmem:[%s407_s19 + $0x28] sm:$0xff]  ;;  %v420_v24 = vmul.f32 %v419_v20, %v2625_v17  ;;  %v421_v25 = vmul.f32 %v419_v20, %v2627_v18  ;;  %v423_v26 = vstv %s2568_s21  ;;  %1984 = vmatprep.subr.mxu0 %v710_v8  ;;  %s2647_s12 = sld [smem:[#allocation5 + $0x1]]  ;;  %v708_v29 = vld [vmem:[%s3653_s3 + $0xd0] sm:$0xff] }
  0x36   : > { %2018 = vmatpush3.msra.mxu1 %v727_v15  ;;  %v424_v27 = vmul.f32 %v423_v26, %v2629_v19  ;;  %v425_v28 = vmul.f32 %v423_v26, %v2634_v21  ;;  %1985 = vmatpush3.msra.mxu0 %v694_v11  ;;  %v726_v30 = vld [vmem:[%s3653_s3 + $0x160] sm:$0xff]  ;;  %v429_v31 = vstv %s2588_s14  ;;  %s2656_s21 = sld [smem:[#allocation3 + $0x100]]  ;;  %v692_v32 = vld [vmem:[%s3653_s3 + $0x50] sm:$0xff]  ;;  %v741_v33 = vld [vmem:[%s3653_s3 + $0x1d8] sm:$0xff] }
  0x37   : > { %2019 = vmatprep.subr.mxu1 %v742_v16  ;;  %1986 = vmatprep.subr.mxu0 %v709_v12  ;;  %v430_v36 = vmul.f32 %v429_v31, %v2636_v22  ;;  %v431_v37 = vmul.f32 %v429_v31, %v2638_v23  ;;  %s2666_s28 = sld [smem:[#allocation3 + $0x101]]  ;;  %v707_v38 = vld [vmem:[%s3653_s3 + $0xc8] sm:$0xff]  ;;  %v725_v39 = vld [vmem:[%s3653_s3 + $0x158] sm:$0xff]  ;;  %v435_v40 = vstv %s2600_s25 }
  0x38   : > { %2020 = vmatpush3.msra.mxu1 %v726_v30  ;;  %v426_v34 = vadd.f32 %v424_v27, %v420_v24  ;;  %v427_v35 = vadd.f32 %v425_v28, %v421_v25  ;;  %1987 = vmatpush3.msra.mxu0 %v693_v14  ;;  %v450_v41 = vstv %s2614_s20  ;;  %s2676_s16 = sld [smem:[#allocation3 + $0x102]]  ;;  %v691_v42 = vld [vmem:[%s3653_s3 + $0x48] sm:$0xff] }
  0x39   : > { %1988 = vmatprep.subr.mxu0 %v708_v29  ;;  %2021 = vmatprep.subr.mxu1 %v741_v33  ;;  %v451_v45 = vmul.f32 %v450_v41, %v2625_v17  ;;  %v452_v46 = vmul.f32 %v450_v41, %v2627_v18  ;;  %s2683_s23 = sld [smem:[#allocation5 + $0x2]]  ;;  %v454_v47 = vstv %s2632_s24 }
  0x3a   : > { %v432_v43 = vadd.f32 %v430_v36, %v426_v34  ;;  %v433_v44 = vadd.f32 %v431_v37, %v427_v35  ;;  %1989 = vmatpush3.msra.mxu0 %v692_v32  ;;  %v460_v48 = vstv %s2643_s30  ;;  %s2687_s25 = sld [smem:[#allocation3 + $0x180]]  ;;  %2022 = vmatpush3.msra.mxu1 %v725_v39  ;;  %v455_v51 = vmul.f32 %v454_v47, %v2629_v19 }
  0x3b   : > { %1990 = vmatprep.subr.mxu0 %v707_v38  ;;  %v456_v52 = vmul.f32 %v454_v47, %v2634_v21  ;;  %s2695_s20 = sld [smem:[#allocation3 + $0x181]]  ;;  %v461_v53 = vmul.f32 %v460_v48, %v2636_v22  ;;  %v462_v54 = vmul.f32 %v460_v48, %v2638_v23  ;;  %v466_v60 = vstv %s2647_s12 }
  0x3c   : > { %v2689_v49 = vadd.f32 %v435_v40, %v432_v43  ;;  %v2691_v50 = vadd.f32 %v435_v40, %v433_v44  ;;  %1991 = vmatpush3.msra.mxu0 %v691_v42  ;;  %v481_v55 = vstv %s2656_s21  ;;  %s2700_s24 = sld [smem:[#allocation3 + $0x182]]  ;;  %v457_v57 = vadd.f32 %v455_v51, %v451_v45 }
  0x3d   : > { %v458_v58 = vadd.f32 %v456_v52, %v452_v46  ;;  %v482_v59 = vmul.f32 %v481_v55, %v2625_v17  ;;  %s2705_s30 = sld [smem:[#allocation5 + $0x3]]  ;;  %v483_v61 = vmul.f32 %v481_v55, %v2627_v18  ;;  %v485_v62 = vstv %s2666_s28 }
  0x3e   : > { %v438_v56 = vmax.f32 %v2689_v49, %v2691_v50  ;;  %v491_v63 = vstv %s2676_s16  ;;  %s2711_s26 = sld [smem:[#allocation3 + $0x200]]  ;;  %v463_v0 = vadd.f32 %v461_v53, %v457_v57  ;;  %v486_v2 = vmul.f32 %v485_v62, %v2629_v19  ;;  %v740_v57 = vld [vmem:[%s3653_s3 + $0x1d0] sm:$0xff] }
  0x3f   : > { %v464_v1 = vadd.f32 %v462_v54, %v458_v58  ;;  %v487_v3 = vmul.f32 %v485_v62, %v2634_v21  ;;  %s2715_s21 = sld [smem:[#allocation3 + $0x201]]  ;;  %v492_v4 = vmul.f32 %v491_v63, %v2636_v22  ;;  %v493_v5 = vmul.f32 %v491_v63, %v2638_v23  ;;  %2023 = vmatprep.subr.mxu1 %v740_v57  ;;  %v690_v62 = vld [vmem:[%s3653_s3 + $0x40] sm:$0xff]  ;;  %v721_v57 = vld [vmem:[%s3653_s3 + $0x138] sm:$0xff] }
  0x40   : > { %439 = vmax.xlane.f32.xlu0 %v438_v56  ;;  %v497_v6 = vstv %s2683_s23  ;;  %v512_v7 = vstv %s2687_s25  ;;  %s2721_s12 = sld [smem:[#allocation3 + $0x202]]  ;;  %v2723_v8 = vadd.f32 %v466_v60, %v463_v0  ;;  %v488_v10 = vadd.f32 %v486_v2, %v482_v59  ;;  %v706_v56 = vld [vmem:[%s3653_s3 + $0xc0] sm:$0xff] }
  0x41   : > { %v2725_v9 = vadd.f32 %v466_v60, %v464_v1  ;;  %v489_v11 = vadd.f32 %v487_v3, %v483_v61  ;;  %s2727_s27 = sld [smem:[#allocation5 + $0x4]]  ;;  %v513_v12 = vmul.f32 %v512_v7, %v2625_v17  ;;  %v514_v13 = vmul.f32 %v512_v7, %v2627_v18  ;;  %1992 = vmatprep.subr.mxu0 %v706_v56  ;;  %v724_v3 = vld [vmem:[%s3653_s3 + $0x150] sm:$0xff] }
  0x42   : > { %v516_v14 = vstv %s2695_s20  ;;  %v522_v15 = vstv %s2700_s24  ;;  %s2733_s28 = sld [smem:[#allocation3 + $0x280]]  ;;  %v494_v20 = vadd.f32 %v492_v4, %v488_v10  ;;  %1993 = vmatpush3.msra.mxu0 %v690_v62  ;;  %v705_v4 = vld [vmem:[%s3653_s3 + $0xb8] sm:$0xff]  ;;  %2024 = vmatpush3.msra.mxu1 %v724_v3  ;;  %s2447_s24 = smov 16  }
  0x43   : > { %v469_v16 = vmax.f32 %v2723_v8, %v2725_v9  ;;  %v495_v24 = vadd.f32 %v493_v5, %v489_v11  ;;  %v517_v25 = vmul.f32 %v516_v14, %v2629_v19  ;;  %s2738_s14 = sld [smem:[#allocation3 + $0x281]]  ;;  %v518_v26 = vmul.f32 %v516_v14, %v2634_v21  ;;  %v739_v5 = vld [vmem:[%s3653_s3 + $0x1c8] sm:$0xff]  ;;  %1994 = vmatprep.subr.mxu0 %v705_v4 }
  0x44   : > { %v523_v27 = vmul.f32 %v522_v15, %v2636_v22  ;;  %v524_v28 = vmul.f32 %v522_v15, %v2638_v23  ;;  %v528_v29 = vstv %s2705_s30  ;;  %s2744_s29 = sld [smem:[#allocation3 + $0x282]]  ;;  %v2746_v30 = vadd.f32 %v497_v6, %v494_v20  ;;  %2025 = vmatprep.subr.mxu1 %v739_v5  ;;  %s2448_s30 = smov 8  }
  0x45   : > { %470 = vmax.xlane.f32.xlu0 %v469_v16  ;;  %v2748_v31 = vadd.f32 %v497_v6, %v495_v24  ;;  %v519_v32 = vadd.f32 %v517_v25, %v513_v12  ;;  %v543_v33 = vstv %s2711_s26  ;;  %s2751_s13 = sld [smem:[#allocation5 + $0x5]]  ;;  %v520_v34 = vadd.f32 %v518_v26, %v514_v13  ;;  %v689_v12 = vld [vmem:[%s3653_s3 + $0x38] sm:$0xff]  ;;  %v723_v13 = vld [vmem:[%s3653_s3 + $0x148] sm:$0xff] }
  0x46   : > { %v544_v35 = vmul.f32 %v543_v33, %v2625_v17  ;;  %v545_v36 = vmul.f32 %v543_v33, %v2627_v18  ;;  %v547_v37 = vstv %s2715_s21  ;;  %s2756_s15 = sld [smem:[#allocation3 + $0x300]]  ;;  %v553_v43 = vstv %s2721_s12  ;;  %1995 = vmatpush3.msra.mxu0 %v689_v12  ;;  %2026 = vmatpush3.msra.mxu1 %v723_v13  ;;  %v700_v13 = vld [vmem:[%s3653_s3 + $0x90] sm:$0xff] }
  0x47   : > { %v500_v38 = vmax.f32 %v2746_v30, %v2748_v31  ;;  %v525_v39 = vadd.f32 %v523_v27, %v519_v32  ;;  %v548_v40 = vmul.f32 %v547_v37, %v2629_v19  ;;  %v549_v41 = vmul.f32 %v547_v37, %v2634_v21  ;;  %s2762_s16 = sld [smem:[#allocation3 + $0x301]]  ;;  %v722_v37 = vld [vmem:[%s3653_s3 + $0x140] sm:$0xff] }
  0x48   : > { %v526_v42 = vadd.f32 %v524_v28, %v520_v34  ;;  %v559_v44 = vstv %s2727_s27  ;;  %v574_v45 = vstv %s2733_s28  ;;  %s2767_s19 = sld [smem:[#allocation3 + $0x302]]  ;;  %v554_v51 = vmul.f32 %v553_v43, %v2636_v22  ;;  %v704_v28 = vld [vmem:[%s3653_s3 + $0xb0] sm:$0xff]  ;;  %s2450_s28 = smov 120  }
  0x49   : > { %501 = vmax.xlane.f32.xlu1 %v500_v38  ;;  %v2769_v46 = vadd.f32 %v528_v29, %v525_v39  ;;  %v550_v47 = vadd.f32 %v548_v40, %v544_v35  ;;  %v551_v48 = vadd.f32 %v549_v41, %v545_v36  ;;  %s2772_s22 = sld [smem:[#allocation5 + $0x6]]  ;;  %v555_v53 = vmul.f32 %v553_v43, %v2638_v23  ;;  %v738_v35 = vld [vmem:[%s3653_s3 + $0x1c0] sm:$0xff]  ;;  %v688_v36 = vld [vmem:[%s3653_s3 + $0x30] sm:$0xff] }
  0x4a   : > { %v2774_v52 = vadd.f32 %v528_v29, %v526_v42  ;;  %v575_v54 = vmul.f32 %v574_v45, %v2625_v17  ;;  %v576_v55 = vmul.f32 %v574_v45, %v2627_v18  ;;  %s2779_s23 = sld [smem:[#allocation3 + $0x380]]  ;;  %v578_v59 = vstv %s2738_s14  ;;  %1996 = vmatprep.subr.mxu0 %v704_v28  ;;  %2027 = vmatprep.subr.mxu1 %v738_v35  ;;  %v703_v42 = vld [vmem:[%s3653_s3 + $0xa8] sm:$0xff]  ;;  %v733_v28 = vld [vmem:[%s3653_s3 + $0x198] sm:$0xff]  ;;  %v732_v35 = vld [vmem:[%s3653_s3 + $0x190] sm:$0xff] }
  0x4b   : > { %v556_v58 = vadd.f32 %v554_v51, %v550_v47  ;;  %v584_v60 = vstv %s2744_s29  ;;  %v590_v61 = vstv %s2751_s13  ;;  %s2790_s26 = sld [smem:[#allocation3 + $0x381]]  ;;  %v557_v0 = vadd.f32 %v555_v53, %v551_v48  ;;  %v737_v48 = vld [vmem:[%s3653_s3 + $0x1b8] sm:$0xff]  ;;  %v687_v51 = vld [vmem:[%s3653_s3 + $0x28] sm:$0xff]  ;;  %1997 = vmatpush3.msra.mxu0 %v688_v36  ;;  %2028 = vmatpush3.msra.mxu1 %v722_v37 }
  0x4c   : > { %v531_v63 = vmax.f32 %v2769_v46, %v2774_v52  ;;  %v579_v1 = vmul.f32 %v578_v59, %v2629_v19  ;;  %v580_v2 = vmul.f32 %v578_v59, %v2634_v21  ;;  %s2799_s27 = sld [smem:[#allocation3 + $0x382]]  ;;  %v585_v7 = vmul.f32 %v584_v60, %v2636_v22  ;;  %1998 = vmatprep.subr.mxu0 %v703_v42  ;;  %v682_v36 = vld [vmem:[%s3653_s3] sm:$0xff]  ;;  %v716_v37 = vld [vmem:[%s3653_s3 + $0x110] sm:$0xff] }
  0x4d   : > { %v2810_v6 = vadd.f32 %v559_v44, %v556_v58  ;;  %v586_v10 = vmul.f32 %v584_v60, %v2638_v23  ;;  %v605_v11 = vstv %s2756_s15  ;;  %v2821_v14 = vadd.f32 %v559_v44, %v557_v0  ;;  %s2828_s15 = sld [smem:[#allocation5 + $0x7]]  ;;  %2029 = vmatprep.subr.mxu1 %v737_v48  ;;  %1999 = vmatpush3.msra.mxu0 %v687_v51  ;;  %v714_v42 = vld [vmem:[%s3653_s3 + $0x100] sm:$0xff] }
  0x4e   : > { %532 = vmax.xlane.f32.xlu1 %v531_v63  ;;  %v581_v15 = vadd.f32 %v579_v1, %v575_v54  ;;  %v582_v16 = vadd.f32 %v580_v2, %v576_v55  ;;  %v606_v20 = vmul.f32 %v605_v11, %v2625_v17  ;;  %v607_v24 = vmul.f32 %v605_v11, %v2627_v18 }
  0x4f   : > { %v609_v25 = vstv %s2762_s16  ;;  %v615_v26 = vstv %s2767_s19  ;;  %v621_v27 = vstv %s2772_s22  ;;  %v562_v29 = vmax.f32 %v2810_v6, %v2821_v14  ;;  %2030 = vmatpush3.msra.mxu1 %v721_v57  ;;  %s1937_s19 = sshll.u32 %s3672_s18, 3 }
  0x50   : > { %v587_v32 = vadd.f32 %v585_v7, %v581_v15  ;;  %v588_v33 = vadd.f32 %v586_v10, %v582_v16  ;;  %v610_v34 = vmul.f32 %v609_v25, %v2629_v19  ;;  %v611_v38 = vmul.f32 %v609_v25, %v2634_v21  ;;  %v685_v7 = vld [vmem:[%s3653_s3 + $0x18] sm:$0xff]  ;;  %v719_v10 = vld [vmem:[%s3653_s3 + $0x128] sm:$0xff]  ;;  %v734_v16 = vld [vmem:[%s3653_s3 + $0x1a0] sm:$0xff]  ;;  %s411_s29 = scalar_lea.vmem %s3661_s11, %s1937_s19 }
  0x51   : > { %v616_v39 = vmul.f32 %v615_v26, %v2636_v22  ;;  %v617_v40 = vmul.f32 %v615_v26, %v2638_v23  ;;  %v636_v41 = vstv %s2779_s23  ;;  %563 = vmax.xlane.f32.xlu0 %v562_v29  ;;  %v640_v55 = vstv %s2790_s26  ;;  %v718_v26 = vld [vmem:[%s3653_s3 + $0x120] sm:$0xff]  ;;  %s2449_s23 = smov 112  }
  0x52   : > { %v2852_v43 = vadd.f32 %v590_v61, %v587_v32  ;;  %v2854_v44 = vadd.f32 %v590_v61, %v588_v33  ;;  %v612_v45 = vadd.f32 %v610_v34, %v606_v20  ;;  %v637_v47 = vmul.f32 %v636_v41, %v2625_v17  ;;  %v736_v61 = vld [vmem:[%s3653_s3 + $0x1b0] sm:$0xff]  ;;  %v683_v32 = vld [vmem:[%s3653_s3 + $0x8] sm:$0xff]  ;;  %v717_v33 = vld [vmem:[%s3653_s3 + $0x118] sm:$0xff] }
  0x53   : > { %v613_v53 = vadd.f32 %v611_v38, %v607_v24  ;;  %v638_v54 = vmul.f32 %v636_v41, %v2627_v18  ;;  %v646_v56 = vstv %s2799_s27  ;;  %v641_v59 = vmul.f32 %v640_v55, %v2629_v19  ;;  %v702_v18 = vld [vmem:[%s3653_s3 + $0xa0] sm:$0xff]  ;;  %2031 = vmatprep.subr.mxu1 %v736_v61  ;;  %v684_v20 = vld [vmem:[%s3653_s3 + $0x10] sm:$0xff]  ;;  %v731_v38 = vld [vmem:[%s3653_s3 + $0x188] sm:$0xff] }
  0x54   : > { %v593_v17 = vmax.f32 %v2852_v43, %v2854_v44  ;;  %v618_v58 = vadd.f32 %v616_v39, %v612_v45  ;;  %v642_v60 = vmul.f32 %v640_v55, %v2634_v21  ;;  %v647_v63 = vmul.f32 %v646_v56, %v2636_v22  ;;  %v686_v19 = vld [vmem:[%s3653_s3 + $0x20] sm:$0xff]  ;;  %v720_v21 = vld [vmem:[%s3653_s3 + $0x130] sm:$0xff]  ;;  %v701_v22 = vld [vmem:[%s3653_s3 + $0x98] sm:$0xff]  ;;  %2000 = vmatprep.subr.mxu0 %v702_v18 }
  0x55   : > { %v619_v62 = vadd.f32 %v617_v40, %v613_v53  ;;  %v648_v0 = vmul.f32 %v646_v56, %v2638_v23  ;;  %v643_v2 = vadd.f32 %v641_v59, %v637_v47  ;;  %v735_v23 = vld [vmem:[%s3653_s3 + $0x1a8] sm:$0xff]  ;;  %v652_v5 = vstv %s2828_s15  ;;  %2001 = vmatpush3.msra.mxu0 %v686_v19  ;;  %2032 = vmatpush3.msra.mxu1 %v720_v21  ;;  %v698_v34 = vld [vmem:[%s3653_s3 + $0x80] sm:$0xff]  ;;  %v777_v39 = vld [vmem:[%s3653_s3 + $0x2f8] sm:$0xff] }
  0x56   : > { %594 = vmax.xlane.f32.xlu1 %v593_v17  ;;  %v2887_v1 = vadd.f32 %v621_v27, %v618_v58  ;;  %v644_v3 = vadd.f32 %v642_v60, %v638_v54  ;;  %2002 = vmatprep.subr.mxu0 %v701_v22  ;;  %v715_v40 = vld [vmem:[%s3653_s3 + $0x108] sm:$0xff]  ;;  %v730_v41 = vld [vmem:[%s3653_s3 + $0x180] sm:$0xff]  ;;  %v809_v45 = vld [vmem:[%s3653_s3 + $0x3f8] sm:$0xff] }
  0x57   : > { %v2895_v4 = vadd.f32 %v621_v27, %v619_v62  ;;  %v649_v11 = vadd.f32 %v647_v63, %v643_v2  ;;  %2033 = vmatprep.subr.mxu1 %v735_v23  ;;  %2003 = vmatpush3.msra.mxu0 %v685_v7  ;;  %v699_v27 = vld [vmem:[%s3653_s3 + $0x88] sm:$0xff]  ;;  %v774_v62 = vld [vmem:[%s3653_s3 + $0x2e0] sm:$0xff]  ;;  %v808_v2 = vld [vmem:[%s3653_s3 + $0x3f0] sm:$0xff] }
  0x58   : > { %v650_v12 = vadd.f32 %v648_v0, %v644_v3  ;;  %2034 = vmatpush3.msra.mxu1 %v719_v10  ;;  %2004 = vmatprep.subr.mxu0 %v700_v13  ;;  %v759_v18 = vld [vmem:[%s3653_s3 + $0x268] sm:$0xff]  ;;  %v793_v0 = vld [vmem:[%s3653_s3 + $0x378] sm:$0xff]  ;;  %v758_v19 = vld [vmem:[%s3653_s3 + $0x260] sm:$0xff] }
  0x59   : > { %v624_v15 = vmax.f32 %v2887_v1, %v2895_v4  ;;  %v2915_v24 = vadd.f32 %v652_v5, %v649_v11  ;;  %2035 = vmatprep.subr.mxu1 %v734_v16  ;;  %2005 = vmatpush3.msra.mxu0 %v684_v20  ;;  %v773_v3 = vld [vmem:[%s3653_s3 + $0x2d8] sm:$0xff]  ;;  %v792_v22 = vld [vmem:[%s3653_s3 + $0x370] sm:$0xff]  ;;  %v791_v10 = vld [vmem:[%s3653_s3 + $0x368] sm:$0xff] }
  0x5a   : > { %v2917_v25 = vadd.f32 %v652_v5, %v650_v12  ;;  %2036 = vmatpush3.msra.mxu1 %v718_v26  ;;  %2006 = vmatprep.subr.mxu0 %v699_v27  ;;  %v757_v23 = vld [vmem:[%s3653_s3 + $0x258] sm:$0xff]  ;;  %v807_v5 = vld [vmem:[%s3653_s3 + $0x3e8] sm:$0xff]  ;;  %v772_v7 = vld [vmem:[%s3653_s3 + $0x2d0] sm:$0xff] }
  0x5b   : > { %625 = vmax.xlane.f32.xlu0 %v624_v15  ;;  %2037 = vmatprep.subr.mxu1 %v733_v28  ;;  %v756_v11 = vld [vmem:[%s3653_s3 + $0x250] sm:$0xff]  ;;  %v806_v13 = vld [vmem:[%s3653_s3 + $0x3e0] sm:$0xff]  ;;  %v771_v16 = vld [vmem:[%s3653_s3 + $0x2c8] sm:$0xff] }
  0x5c   : > { %v655_v29 = vmax.f32 %v2915_v24, %v2917_v25  ;;  %2007 = vmatpush3.msra.mxu0 %v683_v32  ;;  %2038 = vmatpush3.msra.mxu1 %v717_v33  ;;  %v790_v20 = vld [vmem:[%s3653_s3 + $0x360] sm:$0xff] }
  0x5d   : > { %2008 = vmatprep.subr.mxu0 %v698_v34  ;;  %2039 = vmatprep.subr.mxu1 %v732_v35  ;;  %v770_v27 = vld [vmem:[%s3653_s3 + $0x2c0] sm:$0xff]  ;;  %v804_v34 = vld [vmem:[%s3653_s3 + $0x3d0] sm:$0xff] }
  0x5e   : > { %656 = vmax.xlane.f32.xlu1 %v655_v29  ;;  %2009 = vmatpush3.msra.mxu0 %v682_v36  ;;  %v789_v29 = vld [vmem:[%s3653_s3 + $0x358] sm:$0xff]  ;;  %v754_v32 = vld [vmem:[%s3653_s3 + $0x240] sm:$0xff] }
  0x5f   : > { %2040 = vmatpush3.msra.mxu1 %v716_v37  ;;  %2048 = vmatprep.subr.mxu0 %v777_v39  ;;  %v769_v36 = vld [vmem:[%s3653_s3 + $0x2b8] sm:$0xff]  ;;  %v788_v37 = vld [vmem:[%s3653_s3 + $0x350] sm:$0xff] }
  0x60   : > { %2041 = vmatprep.subr.mxu1 %v731_v38  ;;  %v753_v39 = vld [vmem:[%s3653_s3 + $0x238] sm:$0xff] }
  0x61   : > { %2042 = vmatpush3.msra.mxu1 %v715_v40  ;;  %v768_v40 = vld [vmem:[%s3653_s3 + $0x2b0] sm:$0xff] }
  0x62   : > { %2043 = vmatprep.subr.mxu1 %v730_v41  ;;  %v752_v41 = vld [vmem:[%s3653_s3 + $0x230] sm:$0xff] }
  0x63   : > { %2044 = vmatpush3.msra.mxu1 %v714_v42 }
  0x64   : > { %2083 = vmatprep.subr.mxu1 %v809_v45  ;;  %v802_v45 = vld [vmem:[%s3653_s3 + $0x3c0] sm:$0xff] }
  0xc9   : > { %v440_v47 = vpop.xlane.xlu0 %439 }
  0xca   : > { %v441_v48 = vsub.f32 %v2689_v49, %v440_v47  ;;  %v442_v51 = vsub.f32 %v2691_v50, %v440_v47  ;;  %v761_v49 = vld [vmem:[%s3653_s3 + $0x278] sm:$0xff]  ;;  %v776_v50 = vld [vmem:[%s3653_s3 + $0x2f0] sm:$0xff]  ;;  %v767_v47 = vld [vmem:[%s3653_s3 + $0x2a8] sm:$0xff] }
  0xcc   : > { %v443_v53 = vmul.f32 1.442695, %v441_v48  ;;  %v445_v54 = vmul.f32 1.442695, %v442_v51  ;;  %v786_v51 = vld [vmem:[%s3653_s3 + $0x340] sm:$0xff] }
  0xce   : > { %2363 = vpow2.f32 %v443_v53  ;;  %v471_v55 = vpop.xlane.xlu0 %470  ;;  %v751_v53 = vld [vmem:[%s3653_s3 + $0x228] sm:$0xff] }
  0xcf   : > { %2365 = vpow2.f32 %v445_v54  ;;  %v472_v56 = vsub.f32 %v2723_v8, %v471_v55  ;;  %v473_v57 = vsub.f32 %v2725_v9, %v471_v55  ;;  %v760_v8 = vld [vmem:[%s3653_s3 + $0x270] sm:$0xff]  ;;  %v775_v9 = vld [vmem:[%s3653_s3 + $0x2e8] sm:$0xff]  ;;  %v801_v54 = vld [vmem:[%s3653_s3 + $0x3b8] sm:$0xff] }
  0xd0   : > { %v766_v55 = vld [vmem:[%s3653_s3 + $0x2a0] sm:$0xff] }
  0xd1   : > { %v474_v17 = vmul.f32 1.442695, %v472_v56  ;;  %v476_v58 = vmul.f32 1.442695, %v473_v57  ;;  %v785_v56 = vld [vmem:[%s3653_s3 + $0x338] sm:$0xff]  ;;  %v750_v57 = vld [vmem:[%s3653_s3 + $0x220] sm:$0xff] }
  0xd2   : > { %v502_v21 = vpop.xlane.xlu1 %501 }
  0xd3   : > { %2367 = vpow2.f32 %v474_v17  ;;  %v504_v12 = vsub.f32 %v2748_v31, %v502_v21  ;;  %v503_v15 = vsub.f32 %v2746_v30, %v502_v21  ;;  %v755_v31 = vld [vmem:[%s3653_s3 + $0x248] sm:$0xff]  ;;  %v805_v30 = vld [vmem:[%s3653_s3 + $0x3d8] sm:$0xff]  ;;  %v800_v17 = vld [vmem:[%s3653_s3 + $0x3b0] sm:$0xff] }
  0xd4   : > { %2369 = vpow2.f32 %v476_v58  ;;  %v765_v58 = vld [vmem:[%s3653_s3 + $0x298] sm:$0xff] }
  0xd5   : > { %v507_v28 = vmul.f32 1.442695, %v504_v12  ;;  %v505_v33 = vmul.f32 1.442695, %v503_v15  ;;  %v781_v21 = vld [vmem:[%s3653_s3 + $0x318] sm:$0xff]  ;;  %v840_v15 = vld [vmem:[%s3653_s3 + $0x4f0] sm:$0xff] }
  0xd6   : > { %v825_v12 = vld [vmem:[%s3653_s3 + $0x478] sm:$0xff] }
  0xd7   : > { %v533_v26 = vpop.xlane.xlu1 %532  ;;  %2371 = vpow2.f32 %v507_v28  ;;  %v823_v28 = vld [vmem:[%s3653_s3 + $0x468] sm:$0xff] }
  0xd8   : > { %v535_v35 = vsub.f32 %v2774_v52, %v533_v26  ;;  %v534_v38 = vsub.f32 %v2769_v46, %v533_v26  ;;  %v803_v52 = vld [vmem:[%s3653_s3 + $0x3c8] sm:$0xff]  ;;  %2373 = vpow2.f32 %v505_v33  ;;  %v824_v26 = vld [vmem:[%s3653_s3 + $0x470] sm:$0xff] }
  0xd9   : > { %v787_v46 = vld [vmem:[%s3653_s3 + $0x348] sm:$0xff]  ;;  %v872_v33 = vld [vmem:[%s3653_s3 + $0x5f0] sm:$0xff] }
  0xda   : > { %v538_v42 = vmul.f32 1.442695, %v535_v35  ;;  %v536_v48 = vmul.f32 1.442695, %v534_v38  ;;  %v856_v35 = vld [vmem:[%s3653_s3 + $0x570] sm:$0xff]  ;;  %v871_v38 = vld [vmem:[%s3653_s3 + $0x5e8] sm:$0xff] }
  0xdb   : > { %v2364_v59 = vpop.eup %2363 }
  0xdc   : > { %v2366_v60 = vpop.eup %2365  ;;  %2375 = vpow2.f32 %v538_v42  ;;  %v820_v42 = vld [vmem:[%s3653_s3 + $0x450] sm:$0xff] }
  0xdd   : > { %1002 = vmatprep.mubr.f32.mxu0 %v2366_v60  ;;  %2377 = vpow2.f32 %v536_v48  ;;  %v749_v60 = vld [vmem:[%s3653_s3 + $0x218] sm:$0xff]  ;;  %v835_v48 = vld [vmem:[%s3653_s3 + $0x4c8] sm:$0xff] }
  0xde   : > { %1003 = vmatmul.mubr.f32.vlgmr.msra.gmra.mxu0 %v2364_v59  ;;  %v784_v59 = vld [vmem:[%s3653_s3 + $0x330] sm:$0xff] }
  0xdf   : > { %2049 = vmatpush3.msra.mxu0 %v761_v49  ;;  %v799_v49 = vld [vmem:[%s3653_s3 + $0x3a8] sm:$0xff] }
  0xe0   : > { %2050 = vmatprep.subr.mxu0 %v776_v50  ;;  %v2368_v61 = vpop.eup %2367  ;;  %v764_v50 = vld [vmem:[%s3653_s3 + $0x290] sm:$0xff] }
  0xe1   : > { %2051 = vmatpush3.msra.mxu0 %v760_v8  ;;  %v2370_v63 = vpop.eup %2369  ;;  %v783_v8 = vld [vmem:[%s3653_s3 + $0x328] sm:$0xff] }
  0xe2   : > { %2052 = vmatprep.subr.mxu0 %v775_v9  ;;  %1072 = vmatprep.mubr.f32.mxu1 %v2370_v63  ;;  %v748_v9 = vld [vmem:[%s3653_s3 + $0x210] sm:$0xff]  ;;  %v747_v63 = vld [vmem:[%s3653_s3 + $0x208] sm:$0xff] }
  0xe3   : > { %2053 = vmatpush3.msra.mxu0 %v759_v18  ;;  %1073 = vmatmul.mubr.f32.vlgmr.msra.gmra.mxu1 %v2368_v61  ;;  %v798_v18 = vld [vmem:[%s3653_s3 + $0x3a0] sm:$0xff]  ;;  %v763_v61 = vld [vmem:[%s3653_s3 + $0x288] sm:$0xff] }
  0xe4   : > { %2054 = vmatprep.subr.mxu0 %v774_v62  ;;  %2084 = vmatpush3.msra.mxu1 %v793_v0  ;;  %v782_v62 = vld [vmem:[%s3653_s3 + $0x320] sm:$0xff]  ;;  %v797_v0 = vld [vmem:[%s3653_s3 + $0x398] sm:$0xff] }
  0xe5   : > { %2055 = vmatpush3.msra.mxu0 %v758_v19  ;;  %2085 = vmatprep.subr.mxu1 %v808_v2  ;;  %v762_v19 = vld [vmem:[%s3653_s3 + $0x280] sm:$0xff] }
  0xe6   : > { %2056 = vmatprep.subr.mxu0 %v773_v3  ;;  %2086 = vmatpush3.msra.mxu1 %v792_v22  ;;  %v746_v2 = vld [vmem:[%s3653_s3 + $0x200] sm:$0xff]  ;;  %v2372_v3 = vpop.eup %2371  ;;  %v796_v22 = vld [vmem:[%s3653_s3 + $0x390] sm:$0xff] }
  0xe7   : > { %2057 = vmatpush3.msra.mxu0 %v757_v23  ;;  %2087 = vmatprep.subr.mxu1 %v807_v5  ;;  %v2374_v23 = vpop.eup %2373  ;;  %v780_v5 = vld [vmem:[%s3653_s3 + $0x310] sm:$0xff] }
  0xe8   : > { %2058 = vmatprep.subr.mxu0 %v772_v7  ;;  %2088 = vmatpush3.msra.mxu1 %v791_v10  ;;  %v795_v7 = vld [vmem:[%s3653_s3 + $0x388] sm:$0xff]  ;;  %v841_v10 = vld [vmem:[%s3653_s3 + $0x4f8] sm:$0xff] }
  0xe9   : > { %2059 = vmatpush3.msra.mxu0 %v756_v11  ;;  %2089 = vmatprep.subr.mxu1 %v806_v13  ;;  %v779_v11 = vld [vmem:[%s3653_s3 + $0x308] sm:$0xff]  ;;  %v794_v13 = vld [vmem:[%s3653_s3 + $0x380] sm:$0xff] }
  0xea   : > { %2060 = vmatprep.subr.mxu0 %v771_v16  ;;  %2090 = vmatpush3.msra.mxu1 %v790_v20  ;;  %v2376_v16 = vpop.eup %2375  ;;  %v778_v20 = vld [vmem:[%s3653_s3 + $0x300] sm:$0xff] }
  0xeb   : > { %2061 = vmatpush3.msra.mxu0 %v755_v31  ;;  %2091 = vmatprep.subr.mxu1 %v805_v30  ;;  %v2378_v31 = vpop.eup %2377  ;;  %v839_v30 = vld [vmem:[%s3653_s3 + $0x4e8] sm:$0xff] }
  0xec   : > { %2062 = vmatprep.subr.mxu0 %v770_v27  ;;  %2092 = vmatpush3.msra.mxu1 %v789_v29  ;;  %v873_v27 = vld [vmem:[%s3653_s3 + $0x5f8] sm:$0xff] }
  0xed   : > { %2063 = vmatpush3.msra.mxu0 %v754_v32  ;;  %2093 = vmatprep.subr.mxu1 %v804_v34  ;;  %v857_v29 = vld [vmem:[%s3653_s3 + $0x578] sm:$0xff]  ;;  %v838_v32 = vld [vmem:[%s3653_s3 + $0x4e0] sm:$0xff] }
  0xee   : > { %2064 = vmatprep.subr.mxu0 %v769_v36  ;;  %2094 = vmatpush3.msra.mxu1 %v788_v37  ;;  %v822_v34 = vld [vmem:[%s3653_s3 + $0x460] sm:$0xff]  ;;  %v564_v36 = vpop.xlane.xlu0 %563  ;;  %v837_v37 = vld [vmem:[%s3653_s3 + $0x4d8] sm:$0xff] }
  0xef   : > { %2065 = vmatpush3.msra.mxu0 %v753_v39  ;;  %2095 = vmatprep.subr.mxu1 %v803_v52  ;;  %v821_v39 = vld [vmem:[%s3653_s3 + $0x458] sm:$0xff]  ;;  %v855_v52 = vld [vmem:[%s3653_s3 + $0x568] sm:$0xff] }
  0xf0   : > { %2066 = vmatprep.subr.mxu0 %v768_v40  ;;  %2096 = vmatpush3.msra.mxu1 %v787_v46  ;;  %v836_v40 = vld [vmem:[%s3653_s3 + $0x4d0] sm:$0xff]  ;;  %v870_v46 = vld [vmem:[%s3653_s3 + $0x5e0] sm:$0xff] }
  0xf1   : > { %2067 = vmatpush3.msra.mxu0 %v752_v41  ;;  %2097 = vmatprep.subr.mxu1 %v802_v45  ;;  %v566_v41 = vsub.f32 %v2821_v14, %v564_v36  ;;  %v854_v45 = vld [vmem:[%s3653_s3 + $0x560] sm:$0xff]  ;;  %v869_v14 = vld [vmem:[%s3653_s3 + $0x5d8] sm:$0xff] }
  0xf2   : > { %2068 = vmatprep.subr.mxu0 %v767_v47  ;;  %2098 = vmatpush3.msra.mxu1 %v786_v51  ;;  %v565_v47 = vsub.f32 %v2810_v6, %v564_v36  ;;  %v595_v51 = vpop.xlane.xlu1 %594  ;;  %v853_v6 = vld [vmem:[%s3653_s3 + $0x558] sm:$0xff]  ;;  %v859_v36 = vld [vmem:[%s3653_s3 + $0x588] sm:$0xff] }
  0xf3   : > { %2069 = vmatpush3.msra.mxu0 %v751_v53  ;;  %2099 = vmatprep.subr.mxu1 %v801_v54  ;;  %v819_v53 = vld [vmem:[%s3653_s3 + $0x448] sm:$0xff]  ;;  %v569_v54 = vmul.f32 1.442695, %v566_v41  ;;  %v842_v41 = vld [vmem:[%s3653_s3 + $0x500] sm:$0xff] }
  0xf4   : > { %2070 = vmatprep.subr.mxu0 %v766_v55  ;;  %2100 = vmatpush3.msra.mxu1 %v785_v56  ;;  %v834_v55 = vld [vmem:[%s3653_s3 + $0x4c0] sm:$0xff]  ;;  %v868_v56 = vld [vmem:[%s3653_s3 + $0x5d0] sm:$0xff] }
  0xf5   : > { %2071 = vmatpush3.msra.mxu0 %v750_v57  ;;  %2101 = vmatprep.subr.mxu1 %v800_v17  ;;  %v567_v57 = vmul.f32 1.442695, %v565_v47  ;;  %v818_v17 = vld [vmem:[%s3653_s3 + $0x440] sm:$0xff]  ;;  %2379 = vpow2.f32 %v569_v54  ;;  %v903_v47 = vld [vmem:[%s3653_s3 + $0x6e8] sm:$0xff] }
  0xf6   : > { %2072 = vmatprep.subr.mxu0 %v765_v58  ;;  %2102 = vmatpush3.msra.mxu1 %v784_v59  ;;  %v852_v58 = vld [vmem:[%s3653_s3 + $0x550] sm:$0xff]  ;;  %v597_v59 = vsub.f32 %v2854_v44, %v595_v51  ;;  %v851_v44 = vld [vmem:[%s3653_s3 + $0x548] sm:$0xff]  ;;  %v886_v54 = vld [vmem:[%s3653_s3 + $0x660] sm:$0xff] }
  0xf7   : > { %2073 = vmatpush3.msra.mxu0 %v749_v60  ;;  %2103 = vmatprep.subr.mxu1 %v799_v49  ;;  %v596_v60 = vsub.f32 %v2852_v43, %v595_v51  ;;  %v833_v49 = vld [vmem:[%s3653_s3 + $0x4b8] sm:$0xff]  ;;  %v832_v43 = vld [vmem:[%s3653_s3 + $0x4b0] sm:$0xff]  ;;  %2381 = vpow2.f32 %v567_v57 }
  0xf8   : > { %2074 = vmatprep.subr.mxu0 %v764_v50  ;;  %2104 = vmatpush3.msra.mxu1 %v783_v8  ;;  %v867_v50 = vld [vmem:[%s3653_s3 + $0x5c8] sm:$0xff]  ;;  %v817_v8 = vld [vmem:[%s3653_s3 + $0x438] sm:$0xff] }
  0xf9   : > { %2075 = vmatpush3.msra.mxu0 %v748_v9  ;;  %2105 = vmatprep.subr.mxu1 %v798_v18  ;;  %v866_v9 = vld [vmem:[%s3653_s3 + $0x5c0] sm:$0xff]  ;;  %v600_v18 = vmul.f32 1.442695, %v597_v59  ;;  %v921_v51 = vld [vmem:[%s3653_s3 + $0x778] sm:$0xff]  ;;  %v919_v59 = vld [vmem:[%s3653_s3 + $0x768] sm:$0xff] }
  0xfa   : > { %2076 = vmatprep.subr.mxu0 %v763_v61  ;;  %2106 = vmatpush3.msra.mxu1 %v782_v62  ;;  %v816_v61 = vld [vmem:[%s3653_s3 + $0x430] sm:$0xff]  ;;  %v850_v62 = vld [vmem:[%s3653_s3 + $0x540] sm:$0xff]  ;;  %v901_v57 = vld [vmem:[%s3653_s3 + $0x6d8] sm:$0xff] }
  0xfb   : > { %2077 = vmatpush3.msra.mxu0 %v747_v63  ;;  %2107 = vmatprep.subr.mxu1 %v797_v0  ;;  %v598_v63 = vmul.f32 1.442695, %v596_v60  ;;  %v831_v0 = vld [vmem:[%s3653_s3 + $0x4a8] sm:$0xff]  ;;  %2383 = vpow2.f32 %v600_v18  ;;  %v657_v60 = vpop.xlane.xlu1 %656 }
  0xfc   : > { %2078 = vmatprep.subr.mxu0 %v762_v19  ;;  %2108 = vmatpush3.msra.mxu1 %v781_v21  ;;  %v865_v19 = vld [vmem:[%s3653_s3 + $0x5b8] sm:$0xff]  ;;  %v815_v21 = vld [vmem:[%s3653_s3 + $0x428] sm:$0xff] }
  0xfd   : > { %2079 = vmatpush3.msra.mxu0 %v746_v2  ;;  %2109 = vmatprep.subr.mxu1 %v796_v22  ;;  %v849_v2 = vld [vmem:[%s3653_s3 + $0x538] sm:$0xff]  ;;  %v864_v22 = vld [vmem:[%s3653_s3 + $0x5b0] sm:$0xff]  ;;  %2385 = vpow2.f32 %v598_v63  ;;  %v899_v18 = vld [vmem:[%s3653_s3 + $0x6c8] sm:$0xff] }
  0xfe   : > { %1142 = vmatprep.mubr.f32.mxu0 %v2372_v3  ;;  %2110 = vmatpush3.msra.mxu1 %v780_v5  ;;  %v830_v3 = vld [vmem:[%s3653_s3 + $0x4a0] sm:$0xff]  ;;  %v848_v5 = vld [vmem:[%s3653_s3 + $0x530] sm:$0xff] }
  0xff   : > { %1143 = vmatmul.mubr.f32.vlgmr.msra.gmra.mxu0 %v2374_v23  ;;  %2111 = vmatprep.subr.mxu1 %v795_v7  ;;  %v814_v23 = vld [vmem:[%s3653_s3 + $0x420] sm:$0xff]  ;;  %v829_v7 = vld [vmem:[%s3653_s3 + $0x498] sm:$0xff] }
 0x100   : > { %2118 = vmatprep.subr.mxu0 %v841_v10  ;;  %2112 = vmatpush3.msra.mxu1 %v779_v11  ;;  %v863_v10 = vld [vmem:[%s3653_s3 + $0x5a8] sm:$0xff]  ;;  %v813_v11 = vld [vmem:[%s3653_s3 + $0x418] sm:$0xff] }
 0x101   : > { %2119 = vmatpush3.msra.mxu0 %v825_v12  ;;  %2113 = vmatprep.subr.mxu1 %v794_v13  ;;  %v847_v12 = vld [vmem:[%s3653_s3 + $0x528] sm:$0xff]  ;;  %v828_v13 = vld [vmem:[%s3653_s3 + $0x490] sm:$0xff] }
 0x102   : > { %2120 = vmatprep.subr.mxu0 %v840_v15  ;;  %2114 = vmatpush3.msra.mxu1 %v778_v20  ;;  %v862_v15 = vld [vmem:[%s3653_s3 + $0x5a0] sm:$0xff] }
 0x103   : > { %1212 = vmatprep.mubr.f32.mxu1 %v2376_v16  ;;  %2121 = vmatpush3.msra.mxu0 %v824_v26  ;;  %v812_v16 = vld [vmem:[%s3653_s3 + $0x410] sm:$0xff]  ;;  %v846_v20 = vld [vmem:[%s3653_s3 + $0x520] sm:$0xff]  ;;  %v861_v26 = vld [vmem:[%s3653_s3 + $0x598] sm:$0xff] }
 0x104   : > { %1213 = vmatmul.mubr.f32.vlgmr.msra.gmra.mxu1 %v2378_v31  ;;  %2122 = vmatprep.subr.mxu0 %v839_v30  ;;  %v827_v31 = vld [vmem:[%s3653_s3 + $0x488] sm:$0xff] }
 0x105   : > { %2153 = vmatprep.subr.mxu1 %v873_v27  ;;  %2123 = vmatpush3.msra.mxu0 %v823_v28  ;;  %v811_v30 = vld [vmem:[%s3653_s3 + $0x408] sm:$0xff]  ;;  %v845_v27 = vld [vmem:[%s3653_s3 + $0x518] sm:$0xff]  ;;  %v826_v28 = vld [vmem:[%s3653_s3 + $0x480] sm:$0xff] }
 0x106   : > { %2154 = vmatpush3.msra.mxu1 %v857_v29  ;;  %2124 = vmatprep.subr.mxu0 %v838_v32  ;;  %v860_v29 = vld [vmem:[%s3653_s3 + $0x590] sm:$0xff]  ;;  %v2380_v32 = vpop.eup %2379 }
 0x107   : > { %2155 = vmatprep.subr.mxu1 %v872_v33  ;;  %2125 = vmatpush3.msra.mxu0 %v822_v34  ;;  %v810_v33 = vld [vmem:[%s3653_s3 + $0x400] sm:$0xff]  ;;  %v2382_v34 = vpop.eup %2381 }
 0x108   : > { %2156 = vmatpush3.msra.mxu1 %v856_v35  ;;  %2126 = vmatprep.subr.mxu0 %v837_v37  ;;  %v844_v35 = vld [vmem:[%s3653_s3 + $0x510] sm:$0xff]  ;;  %v905_v37 = vld [vmem:[%s3653_s3 + $0x6f8] sm:$0xff] }
 0x109   : > { %2157 = vmatprep.subr.mxu1 %v871_v38  ;;  %2127 = vmatpush3.msra.mxu0 %v821_v39  ;;  %v843_v38 = vld [vmem:[%s3653_s3 + $0x508] sm:$0xff]  ;;  %v889_v39 = vld [vmem:[%s3653_s3 + $0x678] sm:$0xff] }
 0x10a   : > { %2158 = vmatpush3.msra.mxu1 %v855_v52  ;;  %2128 = vmatprep.subr.mxu0 %v836_v40  ;;  %v858_v52 = vld [vmem:[%s3653_s3 + $0x580] sm:$0xff]  ;;  %v904_v40 = vld [vmem:[%s3653_s3 + $0x6f0] sm:$0xff] }
 0x10b   : > { %2159 = vmatprep.subr.mxu1 %v870_v46  ;;  %2129 = vmatpush3.msra.mxu0 %v820_v42  ;;  %v2384_v46 = vpop.eup %2383 }
 0x10c   : > { %2160 = vmatpush3.msra.mxu1 %v854_v45  ;;  %2130 = vmatprep.subr.mxu0 %v835_v48  ;;  %v2386_v42 = vpop.eup %2385  ;;  %v888_v45 = vld [vmem:[%s3653_s3 + $0x670] sm:$0xff]  ;;  %v937_v48 = vld [vmem:[%s3653_s3 + $0x7f8] sm:$0xff] }
 0x10d   : > { %2161 = vmatprep.subr.mxu1 %v869_v14  ;;  %2131 = vmatpush3.msra.mxu0 %v819_v53  ;;  %v887_v14 = vld [vmem:[%s3653_s3 + $0x668] sm:$0xff]  ;;  %v902_v53 = vld [vmem:[%s3653_s3 + $0x6e0] sm:$0xff] }
 0x10e   : > { %2162 = vmatpush3.msra.mxu1 %v853_v6  ;;  %2132 = vmatprep.subr.mxu0 %v834_v55  ;;  %v936_v6 = vld [vmem:[%s3653_s3 + $0x7f0] sm:$0xff] }
 0x10f   : > { %2163 = vmatprep.subr.mxu1 %v868_v56  ;;  %2133 = vmatpush3.msra.mxu0 %v818_v17  ;;  %v920_v55 = vld [vmem:[%s3653_s3 + $0x770] sm:$0xff]  ;;  %v626_v56 = vpop.xlane.xlu0 %625  ;;  %v935_v17 = vld [vmem:[%s3653_s3 + $0x7e8] sm:$0xff] }
 0x110   : > { %2164 = vmatpush3.msra.mxu1 %v852_v58  ;;  %2134 = vmatprep.subr.mxu0 %v833_v49  ;;  %v885_v58 = vld [vmem:[%s3653_s3 + $0x658] sm:$0xff]  ;;  %v900_v49 = vld [vmem:[%s3653_s3 + $0x6d0] sm:$0xff] }
 0x111   : > { %2165 = vmatprep.subr.mxu1 %v867_v50  ;;  %2135 = vmatpush3.msra.mxu0 %v817_v8  ;;  %v934_v50 = vld [vmem:[%s3653_s3 + $0x7e0] sm:$0xff]  ;;  %v628_v8 = vsub.f32 %v2895_v4, %v626_v56  ;;  %v933_v4 = vld [vmem:[%s3653_s3 + $0x7d8] sm:$0xff] }
 0x112   : > { %2166 = vmatpush3.msra.mxu1 %v851_v44  ;;  %2136 = vmatprep.subr.mxu0 %v832_v43  ;;  %v884_v44 = vld [vmem:[%s3653_s3 + $0x650] sm:$0xff]  ;;  %v918_v43 = vld [vmem:[%s3653_s3 + $0x760] sm:$0xff] }
 0x113   : > { %2167 = vmatprep.subr.mxu1 %v866_v9  ;;  %2137 = vmatpush3.msra.mxu0 %v816_v61  ;;  %v627_v9 = vsub.f32 %v2887_v1, %v626_v56  ;;  %v659_v61 = vsub.f32 %v2917_v25, %v657_v60  ;;  %v917_v1 = vld [vmem:[%s3653_s3 + $0x758] sm:$0xff]  ;;  %v631_v63 = vmul.f32 1.442695, %v628_v8  ;;  %v932_v25 = vld [vmem:[%s3653_s3 + $0x7d0] sm:$0xff]  ;;  %v906_v56 = vld [vmem:[%s3653_s3 + $0x700] sm:$0xff] }
 0x114   : > { %2168 = vmatpush3.msra.mxu1 %v850_v62  ;;  %2138 = vmatprep.subr.mxu0 %v831_v0  ;;  %v883_v62 = vld [vmem:[%s3653_s3 + $0x648] sm:$0xff]  ;;  %v898_v0 = vld [vmem:[%s3653_s3 + $0x6c0] sm:$0xff] }
 0x115   : > { %2169 = vmatprep.subr.mxu1 %v865_v19  ;;  %2139 = vmatpush3.msra.mxu0 %v815_v21  ;;  %v629_v19 = vmul.f32 1.442695, %v627_v9  ;;  %v882_v21 = vld [vmem:[%s3653_s3 + $0x640] sm:$0xff]  ;;  %2387 = vpow2.f32 %v631_v63 }
 0x116   : > { %2170 = vmatpush3.msra.mxu1 %v849_v2  ;;  %2140 = vmatprep.subr.mxu0 %v830_v3  ;;  %v916_v2 = vld [vmem:[%s3653_s3 + $0x750] sm:$0xff]  ;;  %v658_v3 = vsub.f32 %v2915_v24, %v657_v60 }
 0x117   : > { %2171 = vmatprep.subr.mxu1 %v864_v22  ;;  %2141 = vmatpush3.msra.mxu0 %v814_v23  ;;  %v662_v22 = vmul.f32 1.442695, %v659_v61  ;;  %v897_v23 = vld [vmem:[%s3653_s3 + $0x6b8] sm:$0xff]  ;;  %v896_v24 = vld [vmem:[%s3653_s3 + $0x6b0] sm:$0xff]  ;;  %2389 = vpow2.f32 %v629_v19 }
 0x118   : > { %2172 = vmatpush3.msra.mxu1 %v848_v5  ;;  %2142 = vmatprep.subr.mxu0 %v829_v7  ;;  %v931_v5 = vld [vmem:[%s3653_s3 + $0x7c8] sm:$0xff]  ;;  %v881_v7 = vld [vmem:[%s3653_s3 + $0x638] sm:$0xff] }
 0x119   : > { %2173 = vmatprep.subr.mxu1 %v863_v10  ;;  %2143 = vmatpush3.msra.mxu0 %v813_v11  ;;  %v915_v10 = vld [vmem:[%s3653_s3 + $0x748] sm:$0xff]  ;;  %v930_v11 = vld [vmem:[%s3653_s3 + $0x7c0] sm:$0xff]  ;;  %2391 = vpow2.f32 %v662_v22 }
 0x11a   : > { %2174 = vmatpush3.msra.mxu1 %v847_v12  ;;  %2144 = vmatprep.subr.mxu0 %v828_v13  ;;  %v880_v12 = vld [vmem:[%s3653_s3 + $0x630] sm:$0xff]  ;;  %v914_v13 = vld [vmem:[%s3653_s3 + $0x740] sm:$0xff] }
 0x11b   : > { %2175 = vmatprep.subr.mxu1 %v862_v15  ;;  %2145 = vmatpush3.msra.mxu0 %v812_v16  ;;  %v660_v15 = vmul.f32 1.442695, %v658_v3  ;;  %v895_v16 = vld [vmem:[%s3653_s3 + $0x6a8] sm:$0xff] }
 0x11c   : > { %2176 = vmatpush3.msra.mxu1 %v846_v20  ;;  %2146 = vmatprep.subr.mxu0 %v827_v31  ;;  %v929_v20 = vld [vmem:[%s3653_s3 + $0x7b8] sm:$0xff]  ;;  %v879_v31 = vld [vmem:[%s3653_s3 + $0x628] sm:$0xff] }
 0x11d   : > { %2177 = vmatprep.subr.mxu1 %v861_v26  ;;  %2147 = vmatpush3.msra.mxu0 %v811_v30  ;;  %v913_v26 = vld [vmem:[%s3653_s3 + $0x738] sm:$0xff]  ;;  %v894_v30 = vld [vmem:[%s3653_s3 + $0x6a0] sm:$0xff]  ;;  %2393 = vpow2.f32 %v660_v15 }
 0x11e   : > { %2178 = vmatpush3.msra.mxu1 %v845_v27  ;;  %2148 = vmatprep.subr.mxu0 %v826_v28  ;;  %v928_v27 = vld [vmem:[%s3653_s3 + $0x7b0] sm:$0xff]  ;;  %v878_v28 = vld [vmem:[%s3653_s3 + $0x620] sm:$0xff] }
 0x11f   : > { %2179 = vmatprep.subr.mxu1 %v860_v29  ;;  %2149 = vmatpush3.msra.mxu0 %v810_v33  ;;  %v912_v29 = vld [vmem:[%s3653_s3 + $0x730] sm:$0xff]  ;;  %v927_v33 = vld [vmem:[%s3653_s3 + $0x7a8] sm:$0xff]  ;;  %v1510_v15 = vld [vmem:[%s3655_s5] sm:$0xff] }
 0x120   : > { %1282 = vmatprep.mubr.f32.mxu0 %v2380_v32  ;;  %2180 = vmatpush3.msra.mxu1 %v844_v35  ;;  %v893_v32 = vld [vmem:[%s3653_s3 + $0x698] sm:$0xff]  ;;  %v911_v35 = vld [vmem:[%s3653_s3 + $0x728] sm:$0xff] }
 0x121   : > { %1283 = vmatmul.mubr.f32.vlgmr.msra.gmra.mxu0 %v2382_v34  ;;  %2181 = vmatprep.subr.mxu1 %v859_v36  ;;  %v877_v34 = vld [vmem:[%s3653_s3 + $0x618] sm:$0xff]  ;;  %v892_v36 = vld [vmem:[%s3653_s3 + $0x690] sm:$0xff] }
 0x122   : > { %2188 = vmatprep.subr.mxu0 %v905_v37  ;;  %2182 = vmatpush3.msra.mxu1 %v843_v38  ;;  %v926_v37 = vld [vmem:[%s3653_s3 + $0x7a0] sm:$0xff]  ;;  %v876_v38 = vld [vmem:[%s3653_s3 + $0x610] sm:$0xff] }
 0x123   : > { %2189 = vmatpush3.msra.mxu0 %v889_v39  ;;  %2183 = vmatprep.subr.mxu1 %v858_v52  ;;  %v910_v39 = vld [vmem:[%s3653_s3 + $0x720] sm:$0xff]  ;;  %v891_v52 = vld [vmem:[%s3653_s3 + $0x688] sm:$0xff] }
 0x124   : > { %2190 = vmatprep.subr.mxu0 %v904_v40  ;;  %2184 = vmatpush3.msra.mxu1 %v842_v41  ;;  %v925_v40 = vld [vmem:[%s3653_s3 + $0x798] sm:$0xff] }
 0x125   : > { %1352 = vmatprep.mubr.f32.mxu1 %v2384_v46  ;;  %2191 = vmatpush3.msra.mxu0 %v888_v45  ;;  %v875_v46 = vld [vmem:[%s3653_s3 + $0x608] sm:$0xff]  ;;  %v909_v41 = vld [vmem:[%s3653_s3 + $0x718] sm:$0xff]  ;;  %v924_v45 = vld [vmem:[%s3653_s3 + $0x790] sm:$0xff] }
 0x126   : > { %1353 = vmatmul.mubr.f32.vlgmr.msra.gmra.mxu1 %v2386_v42  ;;  %2192 = vmatprep.subr.mxu0 %v903_v47  ;;  %v890_v42 = vld [vmem:[%s3653_s3 + $0x680] sm:$0xff]  ;;  %v2388_v47 = vpop.eup %2387 }
 0x127   : > { %2223 = vmatprep.subr.mxu1 %v937_v48  ;;  %2193 = vmatpush3.msra.mxu0 %v887_v14  ;;  %v874_v48 = vld [vmem:[%s3653_s3 + $0x600] sm:$0xff]  ;;  %v2390_v14 = vpop.eup %2389 }
 0x128   : > { %2224 = vmatpush3.msra.mxu1 %v921_v51  ;;  %2194 = vmatprep.subr.mxu0 %v902_v53  ;;  %v908_v51 = vld [vmem:[%s3653_s3 + $0x710] sm:$0xff]  ;;  %v2392_v53 = vpop.eup %2391 }
 0x129   : > { %2225 = vmatprep.subr.mxu1 %v936_v6  ;;  %2195 = vmatpush3.msra.mxu0 %v886_v54  ;;  %v923_v6 = vld [vmem:[%s3653_s3 + $0x788] sm:$0xff] }
 0x12a   : > { %2226 = vmatpush3.msra.mxu1 %v920_v55  ;;  %2196 = vmatprep.subr.mxu0 %v901_v57  ;;  %v907_v54 = vld [vmem:[%s3653_s3 + $0x708] sm:$0xff]  ;;  %v922_v55 = vld [vmem:[%s3653_s3 + $0x780] sm:$0xff]  ;;  %v2394_v57 = vpop.eup %2393 }
 0x12b   : > { %2227 = vmatprep.subr.mxu1 %v935_v17  ;;  %2197 = vmatpush3.msra.mxu0 %v885_v58 }
 0x12c   : > { %2228 = vmatpush3.msra.mxu1 %v919_v59  ;;  %2198 = vmatprep.subr.mxu0 %v900_v49 }
 0x12d   : > { %2229 = vmatprep.subr.mxu1 %v934_v50  ;;  %2199 = vmatpush3.msra.mxu0 %v884_v44 }
 0x12e   : > { %2230 = vmatpush3.msra.mxu1 %v918_v43  ;;  %2200 = vmatprep.subr.mxu0 %v899_v18 }
 0x12f   : > { %2231 = vmatprep.subr.mxu1 %v933_v4  ;;  %2201 = vmatpush3.msra.mxu0 %v883_v62 }
 0x130   : > { %2232 = vmatpush3.msra.mxu1 %v917_v1  ;;  %2202 = vmatprep.subr.mxu0 %v898_v0 }
 0x131   : > { %2233 = vmatprep.subr.mxu1 %v932_v25  ;;  %2203 = vmatpush3.msra.mxu0 %v882_v21 }
 0x132   : > { %2234 = vmatpush3.msra.mxu1 %v916_v2  ;;  %2204 = vmatprep.subr.mxu0 %v897_v23 }
 0x133   : > { %2235 = vmatprep.subr.mxu1 %v931_v5  ;;  %2205 = vmatpush3.msra.mxu0 %v881_v7 }
 0x134   : > { %2236 = vmatpush3.msra.mxu1 %v915_v10  ;;  %2206 = vmatprep.subr.mxu0 %v896_v24 }
 0x135   : > { %2237 = vmatprep.subr.mxu1 %v930_v11  ;;  %2207 = vmatpush3.msra.mxu0 %v880_v12 }
 0x136   : > { %2238 = vmatpush3.msra.mxu1 %v914_v13  ;;  %2208 = vmatprep.subr.mxu0 %v895_v16  ;;  %v2445_v16 = vmov 0.0  }
 0x137   : > { %2239 = vmatprep.subr.mxu1 %v929_v20  ;;  %2209 = vmatpush3.msra.mxu0 %v879_v31  ;;  %v1509_v31 = vld [vmem:[%s3654_s4] sm:$0xff] }
 0x138   : > { %2240 = vmatpush3.msra.mxu1 %v913_v26  ;;  %2210 = vmatprep.subr.mxu0 %v894_v30 }
 0x139   : > { %2241 = vmatprep.subr.mxu1 %v928_v27  ;;  %2211 = vmatpush3.msra.mxu0 %v878_v28 }
 0x13a   : > { %2242 = vmatpush3.msra.mxu1 %v912_v29  ;;  %2212 = vmatprep.subr.mxu0 %v893_v32  ;;  %v1678_v29 = vld [vmem:[%s3657_s7 + $0x38] sm:$0xff] }
 0x13b   : > { %2243 = vmatprep.subr.mxu1 %v927_v33  ;;  %2213 = vmatpush3.msra.mxu0 %v877_v34  ;;  %v1677_v33 = vld [vmem:[%s3657_s7 + $0x30] sm:$0xff] }
 0x13c   : > { %2244 = vmatpush3.msra.mxu1 %v911_v35  ;;  %2214 = vmatprep.subr.mxu0 %v892_v36  ;;  %v1676_v35 = vld [vmem:[%s3657_s7 + $0x28] sm:$0xff]  ;;  %v1675_v36 = vld [vmem:[%s3657_s7 + $0x20] sm:$0xff] }
 0x13d   : > { %2245 = vmatprep.subr.mxu1 %v926_v37  ;;  %2215 = vmatpush3.msra.mxu0 %v876_v38  ;;  %v1674_v37 = vld [vmem:[%s3657_s7 + $0x18] sm:$0xff]  ;;  %v1673_v38 = vld [vmem:[%s3657_s7 + $0x10] sm:$0xff] }
 0x13e   : > { %2246 = vmatpush3.msra.mxu1 %v910_v39  ;;  %2216 = vmatprep.subr.mxu0 %v891_v52  ;;  %v1672_v39 = vld [vmem:[%s3657_s7 + $0x8] sm:$0xff]  ;;  %v1671_v52 = vld [vmem:[%s3657_s7] sm:$0xff] }
 0x13f   : > { %2247 = vmatprep.subr.mxu1 %v925_v40  ;;  %2217 = vmatpush3.msra.mxu0 %v875_v46  ;;  %v1768_v40 = vld [vmem:[%s3659_s9 + $0x38] sm:$0xff]  ;;  %v1767_v46 = vld [vmem:[%s3659_s9 + $0x30] sm:$0xff] }
 0x140   : > { %2248 = vmatpush3.msra.mxu1 %v909_v41  ;;  %2218 = vmatprep.subr.mxu0 %v890_v42  ;;  %v1766_v41 = vld [vmem:[%s3659_s9 + $0x28] sm:$0xff]  ;;  %v1765_v42 = vld [vmem:[%s3659_s9 + $0x20] sm:$0xff] }
 0x141   : > { %2249 = vmatprep.subr.mxu1 %v924_v45  ;;  %2219 = vmatpush3.msra.mxu0 %v874_v48  ;;  %v1764_v45 = vld [vmem:[%s3659_s9 + $0x18] sm:$0xff] }
 0x142   : > { %1422 = vmatprep.mubr.f32.mxu0 %v2388_v47  ;;  %2250 = vmatpush3.msra.mxu1 %v908_v51  ;;  %v1970_v51 = vld [vmem:[%s3656_s6] ss:$0 sm:$0xff] }
 0x143   : > { %1423 = vmatmul.mubr.f32.vlgmr.msra.gmra.mxu0 %v2390_v14  ;;  %2251 = vmatprep.subr.mxu1 %v923_v6 }
 0x144   : > { %1492 = vmatprep.mubr.f32.mxu1 %v2392_v53  ;;  %2252 = vmatpush3.msra.mxu1 %v907_v54 }
 0x145   : > { %2253 = vmatprep.subr.mxu1 %v922_v55  ;;  %2280 = vmatprep.subr.mxu0 %v2445_v16 }
 0x146   : > { %2254 = vmatpush3.msra.mxu1 %v906_v56  ;;  %2282 = vmatprep.mubr.msk.f32.mxu0 %vm2446_vm0, %v2445_v16  ;;  %v1763_v56 = vld [vmem:[%s3659_s9 + $0x10] sm:$0xff] }
 0x147   : > { %1493 = vmatmul.mubr.f32.vlgmr.msra.gmra.mxu1 %v2394_v57  ;;  %2281 = vmatpush3.msra.mxu0 %v1510_v15  ;;  %v1762_v57 = vld [vmem:[%s3659_s9 + $0x8] sm:$0xff] }
 0x148   : > { %2285 = vmatprep.subr.mxu1 %v2445_v16  ;;  %2287 = vmatprep.mubr.msk.f32.mxu1 %vm2446_vm0, %v2445_v16 }
 0x149   : > { %2290 = vmatprep.subr.mxu0 %v2445_v16  ;;  %2286 = vmatpush3.msra.mxu1 %v1509_v31 }
 0x14a   : > { %2309 = vmatprep.subr.mxu1 %v2445_v16 }
 0x19e   : > { %v2010_v17 = vpop.f32.mrf.mxu0 }
 0x1a0   : > { %v2011_v59 = vpop.f32.mrf.mxu0 }
 0x1a1   : > { %v2012_v4 = vadd.f32 %v2011_v59, %v2010_v17  ;;  %v1761_v17 = vld [vmem:[%s3659_s9] sm:$0xff] }
 0x1a3   : > { %v2045_v58 = vpop.f32.mrf.mxu1 }
 0x1a5   : > { %v2046_v60 = vpop.f32.mrf.mxu1 }
 0x1a6   : > { %v2047_v9 = vadd.f32 %v2046_v60, %v2045_v58  ;;  %v1971_v58 = vld [vmem:[%s3658_s8] ss:$0 sm:$0xff] }
 0x1a8   : > { %v1075_v1 = vadd.f32 %v2047_v9, %v2012_v4 }
 0x1bf   : > { %v2080_v49 = vpop.f32.mrf.mxu0 }
 0x1c1   : > { %v2081_v8 = vpop.f32.mrf.mxu0 }
 0x1c2   : > { %v2082_v61 = vadd.f32 %v2081_v8, %v2080_v49  ;;  %v1973_v8 = vld [vmem:[%s3660_s10] ss:$0 sm:$0xff] }
 0x1c4   : > { %v2115_v50 = vpop.f32.mrf.mxu1  ;;  %v1145_v25 = vadd.f32 %v2082_v61, %v1075_v1 }
 0x1c6   : > { %v2116_v44 = vpop.f32.mrf.mxu1 }
 0x1c7   : > { %v2117_v63 = vadd.f32 %v2116_v44, %v2115_v50 }
 0x1c9   : > { %v1215_v2 = vadd.f32 %v2117_v63, %v1145_v25 }
 0x1e1   : > { %v2150_v43 = vpop.f32.mrf.mxu0 }
 0x1e3   : > { %v2151_v62 = vpop.f32.mrf.mxu0 }
 0x1e4   : > { %v2152_v19 = vadd.f32 %v2151_v62, %v2150_v43 }
 0x1e6   : > { %v2185_v18 = vpop.f32.mrf.mxu1  ;;  %v1285_v23 = vadd.f32 %v2152_v19, %v1215_v2 }
 0x1e8   : > { %v2186_v0 = vpop.f32.mrf.mxu1 }
 0x1e9   : > { %v2187_v3 = vadd.f32 %v2186_v0, %v2185_v18 }
 0x1eb   : > { %v1355_v10 = vadd.f32 %v2187_v3, %v1285_v23 }
 0x203   : > { %v2220_v21 = vpop.f32.mrf.mxu0 }
 0x205   : > { %v2221_v22 = vpop.f32.mrf.mxu0 }
 0x206   : > { %v2222_v5 = vadd.f32 %v2221_v22, %v2220_v21 }
 0x207   : > { %v2255_v7 = vpop.f32.mrf.mxu1 }
 0x208   : > { %v1425_v11 = vadd.f32 %v2222_v5, %v1355_v10 }
 0x209   : > { %v2256_v24 = vpop.f32.mrf.mxu1 }
 0x20a   : > { %v2257_v12 = vadd.f32 %v2256_v24, %v2255_v7 }
 0x20c   : > { %v1495_v13 = vadd.f32 %v2257_v12, %v1425_v11 }
 0x20e   : > { %2395 = vrcp.f32 %v1495_v13 }
 0x21b   : > { %v2396_v20 = vpop.eup %2395 }
 0x21c   : > { %1505 = vrot.lane.b32.xlu1 %v2396_v20, %s2447_s24  ;;  %1501 = vrot.lane.b32.xlu0 %v2396_v20, %s2448_s30 }
 0x28e   : > { %v1506_v26 = vpop.permute.xlu1 %1505  ;;  %v1502_v27 = vpop.permute.xlu0 %1501 }
 0x28f   : > { %v1508_v30 = vmul.f32 %v1506_v26, %v1495_v13  ;;  %v1504_v28 = vmul.f32 %v1502_v27, %v1495_v13 }
 0x291   : > { %1512 = vrot.lane.b32.xlu1 %v1508_v30, %s2449_s23 }
 0x295   : > { %1588 = vrot.lane.b32.xlu1 %v1504_v28, %s2450_s28 }
 0x303   : > { %v1513_v32 = vpop.permute.xlu1 %1512 }
 0x304   : > { %2283 = vmatmul.mubr.msk.f32.vlgmr.msra.gmra.mxu0 %vm1514_vm1, %v1513_v32 }
 0x305   : > { %2291 = vmatpush3.msra.mxu0 %v1678_v29  ;;  %2306 = vmatprep.mubr.msk.f32.mxu0 %vm2446_vm0, %v2445_v16 }
 0x306   : > { %2292 = vmatprep.subr.mxu0 %v2445_v16 }
 0x307   : > { %v1589_v34 = vpop.permute.xlu1 %1588  ;;  %2293 = vmatpush3.msra.mxu0 %v1677_v33 }
 0x308   : > { %2288 = vmatmul.mubr.msk.f32.vlgmr.msra.gmra.mxu1 %vm1514_vm1, %v1589_v34  ;;  %2294 = vmatprep.subr.mxu0 %v2445_v16 }
 0x309   : > { %2325 = vmatprep.mubr.msk.f32.mxu1 %vm2446_vm0, %v2445_v16  ;;  %2295 = vmatpush3.msra.mxu0 %v1676_v35 }
 0x30a   : > { %2296 = vmatprep.subr.mxu0 %v2445_v16  ;;  %2310 = vmatpush3.msra.mxu1 %v1768_v40 }
 0x30b   : > { %2297 = vmatpush3.msra.mxu0 %v1675_v36  ;;  %2311 = vmatprep.subr.mxu1 %v2445_v16 }
 0x30c   : > { %2298 = vmatprep.subr.mxu0 %v2445_v16  ;;  %2312 = vmatpush3.msra.mxu1 %v1767_v46 }
 0x30d   : > { %2299 = vmatpush3.msra.mxu0 %v1674_v37  ;;  %2313 = vmatprep.subr.mxu1 %v2445_v16 }
 0x30e   : > { %2300 = vmatprep.subr.mxu0 %v2445_v16  ;;  %2314 = vmatpush3.msra.mxu1 %v1766_v41 }
 0x30f   : > { %2301 = vmatpush3.msra.mxu0 %v1673_v38  ;;  %2315 = vmatprep.subr.mxu1 %v2445_v16 }
 0x310   : > { %2302 = vmatprep.subr.mxu0 %v2445_v16  ;;  %2316 = vmatpush3.msra.mxu1 %v1765_v42 }
 0x311   : > { %2303 = vmatpush3.msra.mxu0 %v1672_v39  ;;  %2317 = vmatprep.subr.mxu1 %v2445_v16 }
 0x312   : > { %2304 = vmatprep.subr.mxu0 %v2445_v16  ;;  %2318 = vmatpush3.msra.mxu1 %v1764_v45 }
 0x313   : > { %2305 = vmatpush3.msra.mxu0 %v1671_v52  ;;  %2319 = vmatprep.subr.mxu1 %v2445_v16 }
 0x314   : > { %2320 = vmatpush3.msra.mxu1 %v1763_v56 }
 0x315   : > { %2321 = vmatprep.subr.mxu1 %v2445_v16 }
 0x316   : > { %2322 = vmatpush3.msra.mxu1 %v1762_v57 }
 0x317   : > { %2323 = vmatprep.subr.mxu1 %v2445_v16 }
 0x318   : > { %2324 = vmatpush3.msra.mxu1 %v1761_v17 }
 0x3c4   : > { %v1583_v47 = vpop.f32.mrf.mxu0 }
 0x3c6   : > { %v2284_v48 = vpop.f32.mrf.mxu0 }
 0x3c8   : > { %v1658_v14 = vpop.f32.mrf.mxu1 }
 0x3c9   : > { %v1659_v53 = vadd.f32 %v1658_v14, %v1583_v47 }
 0x3ca   : > { %v2289_v6 = vpop.f32.mrf.mxu1 }
 0x3cb   : > { %v1669_v54 = vadd.f32 %v1970_v51, %v1659_v53 }
 0x3cd   : > { %v1670_v55 = vmax.f32 %v1669_v54, 0.0 }
 0x3cf   : > { %2307 = vmatmul.mubr.msk.f32.vlgmr.msra.gmra.mxu0 %vm1686_vm2, %v1670_v55 }
 0x48f   : > { %v1756_v59 = vpop.f32.mrf.mxu0 }
 0x490   : > { %v1757_v60 = vadd.f32 %v1971_v58, %v1756_v59 }
 0x491   : > { %v2308_v49 = vpop.f32.mrf.mxu0 }
 0x492   : > { %v1760_v50 = vmax.f32 %v1757_v60, 0.0 }
 0x494   : > { %2326 = vmatmul.mubr.msk.f32.vlgmr.msra.gmra.mxu1 %vm1686_vm2, %v1760_v50 }
 0x554   : > { %v1845_v44 = vpop.f32.mrf.mxu1 }
 0x555   : > { %v1846_v43 = vadd.f32 %v1973_v8, %v1845_v44 }
 0x556   : > { %v2327_v9 = vpop.f32.mrf.mxu1 }
 0x557   : > { %1850 = vst.msk [vmem:[%s411_s29] sm:$0xff] %vm1849_vm3, %v1846_v43 }
 0x558 PF: > { %s23_s17 = sadd.s32 1, %s2441_s17  }
 0x559   : > { %p20_p5 = scmp.ge.s32.totalorder %s23_s17, 4  }
 0x55b   :  { %22 = sbr.rel (!%p20_p5) target bundleno = 2 (0x2), region = 103 }
 0x560   :  { %1870 = vsyncpa [#allocation4], 1 }
 0x561   :  { %1872 = vsyncpa [#allocation4 + $0x1], 1 }
 0x562   :  { %1873 = vsyncpa [#allocation6], 1 }

</bundles_post_ra>
